<compile_context>
chip_gen: v7x
topology: tpu7x:2x2x1
jax: 0.10.0
libtpu: 0.0.40
codegen_flags: <defaults>
</compile_context>

<pallas_src>
import functools

import jax
import jax.numpy as jnp
import numpy as np
from jax.experimental import pallas as pl
from jax.experimental.pallas import tpu as pltpu


# ---------------------------------------------------------------------------
# Helpers
# ---------------------------------------------------------------------------
def _cparams(semantics):
    return pltpu.CompilerParams(
        dimension_semantics=tuple(semantics),
        vmem_limit_bytes=32 * 1024 * 1024,   # fits v5e/v6e/v7x scoped budgets
    )


def _largest_tile(n, target, multiple=16):
    """Largest divisor of n that is a multiple of `multiple` and <= target."""
    best = None
    d = multiple
    while d <= min(n, target):
        if n % d == 0:
            best = d
        d += multiple
    return best if best is not None else n


def _pick_th(h, w, target_rows):
    """Largest even divisor of h with th*w <= target_rows (row-tile height)."""
    best = None
    for th in range(2, h + 1, 2):
        if h % th == 0 and th * w <= target_rows:
            best = th
    if best is None:
        for th in range(2, h + 1, 2):
            if h % th == 0:
                return th
        return h
    return best


# ---------------------------------------------------------------------------
# Kernels
# ---------------------------------------------------------------------------
def _conv1_bn_relu_kernel(x_ref, w_ref, scale_ref, bias_ref, o_ref):
    # x: (TM, Cin) f32, w: (Cin, width) bf16, scale/bias: (1, width) f32.
    y = jnp.dot(x_ref[...].astype(jnp.bfloat16), w_ref[...],
                preferred_element_type=jnp.float32)
    y = y * scale_ref[...] + bias_ref[...]
    o_ref[...] = jnp.maximum(y, 0.0).astype(o_ref.dtype)        # bf16 out


def _conv23_squeeze_kernel(xm_ref, xh_ref, w2_ref, s2_ref, b2_ref,
                           w3_ref, s3_ref, b3_ref, out3_ref, ssum_ref,
                           *, th, iw):
    # xm: (1, TH, W+2, Cw) main rows of padded conv1 output (bf16)
    # xh: (1, 2,  W+2, Cw) 2-row halo below the main rows (bf16)
    # w2: (9*Cw, Cw) bf16 im2col conv2 weight; w3: (Cw, Cexp) bf16.
    t = pl.program_id(1)
    width = w2_ref.shape[1]

    # Halo window (TH+2, W+2, Cw).
    win = jnp.concatenate([xm_ref[0], xh_ref[0]], axis=0)

    # im2col: 9 shifted views concatenated along K -> one long-K MXU matmul.
    cols = [win[dy:dy + th, dx:dx + iw, :]
            for dy in range(3) for dx in range(3)]
    patch = jnp.concatenate(cols, axis=-1).reshape(th * iw, 9 * width)

    y2 = jnp.dot(patch, w2_ref[...], preferred_element_type=jnp.float32)
    a2 = jnp.maximum(y2 * s2_ref[...] + b2_ref[...], 0.0)       # bn2 + relu, f32

    y3 = jnp.dot(a2.astype(jnp.bfloat16), w3_ref[...],
                 preferred_element_type=jnp.float32)
    out3 = y3 * s3_ref[...] + b3_ref[...]                       # bn3, f32
    out3_ref[0] = out3.astype(out3_ref.dtype)

    # SE squeeze: accumulate per-image channel sums across row tiles.
    @pl.when(t == 0)
    def _():
        ssum_ref[...] = jnp.zeros_like(ssum_ref)

    ssum_ref[...] += jnp.sum(out3, axis=0, keepdims=True).reshape(1, 1, -1)


def _se_apply_kernel(ssum_ref, fc1_ref, fc2_ref, x_ref, id_ref, o_ref, *, inv_hw):
    # ssum: (1, 1, Cexp) per-image channel sums; x/id: (1, TR, Cexp) f32.
    pooled = ssum_ref[0] * inv_hw                                # (1, Cexp) mean
    h = jnp.maximum(
        jnp.dot(pooled, fc1_ref[...], preferred_element_type=jnp.float32), 0.0)
    s = jax.nn.sigmoid(
        jnp.dot(h, fc2_ref[...], preferred_element_type=jnp.float32))
    y = x_ref[0] * s + id_ref[0]                                 # SE scale + residual
    o_ref[0] = jnp.maximum(y, 0.0).astype(o_ref.dtype)


# ---------------------------------------------------------------------------
# Forward wrapper
# ---------------------------------------------------------------------------
def se_bottleneck_forward(x_nchw, p, *, c1_rows=512, c2_rows=512, se_rows=512):
    """SEBottleneck.forward. Input/output in PyTorch NCHW layout."""
    N, Cin, H, W = x_nchw.shape
    width = p["w1"].shape[1]
    cexp = p["w3"].shape[1]
    assert Cin == cexp, "downsample=None requires inplanes == planes * 4"
    assert H % 2 == 0, "halo row tiling assumes even H"

    x = jnp.transpose(x_nchw, (0, 2, 3, 1)).astype(jnp.float32)  # NHWC (glue)
    M = N * H * W
    HW = H * W

    # ---- pass 1: conv1 (1x1) + bn1 + relu, tiled over M rows --------------
    tm = _largest_tile(M, c1_rows)
    out1 = pl.pallas_call(
        _conv1_bn_relu_kernel,
        out_shape=jax.ShapeDtypeStruct((M, width), jnp.bfloat16),
        grid=(M // tm,),
        in_specs=[
            pl.BlockSpec((tm, Cin), lambda i: (i, 0)),
            pl.BlockSpec((Cin, width), lambda i: (0, 0)),
            pl.BlockSpec((1, width), lambda i: (0, 0)),
            pl.BlockSpec((1, width), lambda i: (0, 0)),
        ],
        out_specs=pl.BlockSpec((tm, width), lambda i: (i, 0)),
        compiler_params=_cparams(("parallel",)),
    )(x.reshape(M, Cin), p["w1"], p["scale1"], p["bias1"])

    # ---- pass 2: conv2(3x3)+bn2+relu + conv3(1x1)+bn3 + SE squeeze --------
    th = _pick_th(H, W, max(c2_rows, 2 * W))
    n_t = H // th
    xp = jnp.pad(out1.reshape(N, H, W, width),
                 ((0, 0), (1, 1), (1, 1), (0, 0)))               # bf16 halo pad

    out3, ssum = pl.pallas_call(
        functools.partial(_conv23_squeeze_kernel, th=th, iw=W),
        out_shape=(
            jax.ShapeDtypeStruct((N, HW, cexp), jnp.float32),
            jax.ShapeDtypeStruct((N, 1, cexp), jnp.float32),
        ),
        grid=(N, n_t),
        in_specs=[
            # main TH rows of the padded activation
            pl.BlockSpec((1, th, W + 2, width), lambda n, t: (n, t, 0, 0)),
            # 2-row halo directly below (TH even => element offset (t+1)*TH)
            pl.BlockSpec((1, 2, W + 2, width),
                         lambda n, t: (n, (t + 1) * (th // 2), 0, 0)),
            pl.BlockSpec((9 * width, width), lambda n, t: (0, 0)),
            pl.BlockSpec((1, width), lambda n, t: (0, 0)),
            pl.BlockSpec((1, width), lambda n, t: (0, 0)),
            pl.BlockSpec((width, cexp), lambda n, t: (0, 0)),
            pl.BlockSpec((1, cexp), lambda n, t: (0, 0)),
            pl.BlockSpec((1, cexp), lambda n, t: (0, 0)),
        ],
        out_specs=(
            pl.BlockSpec((1, th * W, cexp), lambda n, t: (n, t, 0)),
            pl.BlockSpec((1, 1, cexp), lambda n, t: (n, 0, 0)),   # accumulator
        ),
        compiler_params=_cparams(("parallel", "arbitrary")),
    )(xp, xp, p["w2k"], p["scale2"], p["bias2"],
      p["w3"], p["scale3"], p["bias3"])

    # ---- pass 3: SE excite + scale + residual + relu (in place on out3) ---
    tr = _largest_tile(HW, se_rows)
    ident = x.reshape(N, HW, Cin)
    y = pl.pallas_call(
        functools.partial(_se_apply_kernel, inv_hw=1.0 / HW),
        out_shape=jax.ShapeDtypeStruct((N, HW, cexp), jnp.float32),
        grid=(N, HW // tr),
        in_specs=[
            pl.BlockSpec((1, 1, cexp), lambda n, r: (n, 0, 0)),
            pl.BlockSpec(p["w_fc1"].shape, lambda n, r: (0, 0)),
            pl.BlockSpec(p["w_fc2"].shape, lambda n, r: (0, 0)),
            pl.BlockSpec((1, tr, cexp), lambda n, r: (n, r, 0)),
            pl.BlockSpec((1, tr, cexp), lambda n, r: (n, r, 0)),
        ],
        out_specs=pl.BlockSpec((1, tr, cexp), lambda n, r: (n, r, 0)),
        input_output_aliases={3: 0},                              # reuse out3 buffer
        compiler_params=_cparams(("parallel", "parallel")),
    )(ssum, p["w_fc1"], p["w_fc2"], out3, ident)

    return jnp.transpose(y.reshape(N, H, W, cexp), (0, 3, 1, 2))  # back to NCHW


# ---------------------------------------------------------------------------
# Deterministic synthetic parameters (shapes per SEBottleneck.__init__)
# ---------------------------------------------------------------------------
def init_params(key, inplanes, planes, base_width=64, groups=1, reduction=16):
    width = int(planes * (base_width / 64.0)) * groups
    cexp = planes * 4  # expansion = 4
    ks = jax.random.split(key, 8)

    def w(k, shape, dtype=jnp.float32, scale=0.1):
        return (jax.random.normal(k, shape, jnp.float32) * scale).astype(dtype)

    def bn_fold(k, c):
        kg, kb = jax.random.split(k)
        gamma = 1.0 + 0.1 * jax.random.normal(kg, (c,), jnp.float32)
        beta = 0.1 * jax.random.normal(kb, (c,), jnp.float32)
        running_mean = jnp.zeros((c,), jnp.float32)
        running_var = jnp.ones((c,), jnp.float32)
        eps = 1e-5
        scale = gamma * jax.lax.rsqrt(running_var + eps)
        bias = beta - running_mean * scale
        return scale.reshape(1, c), bias.reshape(1, c)

    s1, b1 = bn_fold(ks[3], width)
    s2, b2 = bn_fold(ks[4], width)
    s3, b3 = bn_fold(ks[5], cexp)
    return dict(
        # Conv weights in matmul layout (bf16 for the MXU):
        #   w1[ci, co]                 <-> torch conv1.weight[co, ci, 0, 0]
        #   w2k[(ky*3+kx)*Cw + ci, co] <-> torch conv2.weight[co, ci, ky, kx]
        #   w3[ci, co]                 <-> torch conv3.weight[co, ci, 0, 0]
        w1=w(ks[0], (inplanes, width), jnp.bfloat16),
        w2k=w(ks[1], (9 * width, width), jnp.bfloat16),
        w3=w(ks[2], (width, cexp), jnp.bfloat16),
        scale1=s1, bias1=b1, scale2=s2, bias2=b2, scale3=s3, bias3=b3,
        w_fc1=w(ks[6], (cexp, cexp // reduction)),
        w_fc2=w(ks[7], (cexp // reduction, cexp)),
    )


# ---------------------------------------------------------------------------
# Pure-JAX reference with the same precision policy (bf16 MXU operands,
# f32 accumulation / BN / SE math) for a sanity check.
# ---------------------------------------------------------------------------
def _dot_bf16(a, b):
    return jnp.dot(a.astype(jnp.bfloat16), b.astype(jnp.bfloat16),
                   preferred_element_type=jnp.float32)


def reference_forward(x_nchw, p):
    N, Cin, H, W = x_nchw.shape
    width = p["w1"].shape[1]
    cexp = p["w3"].shape[1]
    x = jnp.transpose(x_nchw, (0, 2, 3, 1)).astype(jnp.float32)

    out = _dot_bf16(x.reshape(-1, Cin), p["w1"]) * p["scale1"] + p["bias1"]
    out = jnp.maximum(out, 0.0).astype(jnp.bfloat16).reshape(N, H, W, width)

    xp = jnp.pad(out, ((0, 0), (1, 1), (1, 1), (0, 0)))
    cols = [xp[:, dy:dy + H, dx:dx + W, :]
            for dy in range(3) for dx in range(3)]
    patch = jnp.concatenate(cols, axis=-1).reshape(-1, 9 * width)
    out = jnp.dot(patch, p["w2k"], preferred_element_type=jnp.float32)
    out = jnp.maximum(out * p["scale2"] + p["bias2"], 0.0)

    out = _dot_bf16(out, p["w3"]) * p["scale3"] + p["bias3"]
    out = out.reshape(N, H, W, cexp)

    pooled = jnp.mean(out, axis=(1, 2))
    s = jax.nn.sigmoid(jnp.maximum(pooled @ p["w_fc1"], 0.0) @ p["w_fc2"])
    y = jnp.maximum(out * s[:, None, None, :] + x, 0.0)
    return jnp.transpose(y, (0, 3, 1, 2))


if __name__ == "__main__":
    key = jax.random.PRNGKey(0)
    kx, kp = jax.random.split(key)

    # Small shapes consistent with the module; downsample=None requires
    # inplanes == planes * expansion.  planes=32 -> Cexp = 128 (lane-dense).
    N, H, W = 2, 16, 16
    planes = 32
    inplanes = planes * 4            # 128
    x = jax.random.normal(kx, (N, inplanes, H, W), jnp.float32)
    params = init_params(kp, inplanes=inplanes, planes=planes)

    # Small row-tile targets so the test exercises multi-tile grids, the
    # halo BlockSpec and the SE-squeeze accumulation; realistic spatial
    # sizes would use the 512-row defaults.
    fwd = jax.jit(functools.partial(se_bottleneck_forward,
                                    c1_rows=256, c2_rows=128, se_rows=128))
    out = jax.block_until_ready(fwd(x, params))
    ref = jax.block_until_ready(reference_forward(x, params))

    assert out.shape == (N, planes * 4, H, W), out.shape
    np.testing.assert_allclose(np.asarray(out), np.asarray(ref),
                               rtol=1e-2, atol=1e-2)
    print("KERNEL_OK")
</pallas_src>

<mosaic_0001>
module attributes {stable_mosaic.version = 11 : i64} {
  func.func @_conv1_bn_relu_kernel(%arg0: i32, %arg1: memref<256x128xf32, #tpu.memory_space<vmem>>, %arg2: memref<128x32xbf16, #tpu.memory_space<vmem>>, %arg3: memref<1x32xf32, #tpu.memory_space<vmem>>, %arg4: memref<1x32xf32, #tpu.memory_space<vmem>>, %arg5: memref<256x32xbf16, #tpu.memory_space<vmem>>) attributes {dimension_semantics = [#tpu.dimension_semantics<parallel>], iteration_bounds = array<i64: 2>, scalar_prefetch = 0 : i64, scratch_operands = 0 : i64, tpu.core_type = #tpu.core_type<tc>, window_params = [{transform_indices = @transform_0, window_bounds = array<i64: 256, 128>}, {pipeline_mode = #tpu.pipeline_mode<synchronous>, transform_indices = @transform_1, window_bounds = array<i64: 128, 32>}, {pipeline_mode = #tpu.pipeline_mode<synchronous>, transform_indices = @transform_2, window_bounds = array<i64: 1, 32>}, {pipeline_mode = #tpu.pipeline_mode<synchronous>, transform_indices = @transform_3, window_bounds = array<i64: 1, 32>}, {transform_indices = @transform_4, window_bounds = array<i64: 256, 32>}]} {
    %c0 = arith.constant 0 : index
    %c0_0 = arith.constant 0 : index
    %0 = vector.load %arg1[%c0, %c0_0] : memref<256x128xf32, #tpu.memory_space<vmem>>, vector<256x128xf32>
    %1 = arith.truncf %0 : vector<256x128xf32> to vector<256x128xbf16>
    %c0_1 = arith.constant 0 : index
    %c0_2 = arith.constant 0 : index
    %2 = vector.load %arg2[%c0_1, %c0_2] : memref<128x32xbf16, #tpu.memory_space<vmem>>, vector<128x32xbf16>
    %cst = arith.constant dense<0.000000e+00> : vector<256x32xf32>
    %3 = tpu.matmul %1, %2, %cst {dimension_numbers = #tpu.dot_dimension_numbers<[1], [0], [0], [1], [0, 0, 1, 1], [], []>} : vector<256x128xbf16>, vector<128x32xbf16>, vector<256x32xf32> -> vector<256x32xf32>
    %c0_3 = arith.constant 0 : index
    %c0_4 = arith.constant 0 : index
    %4 = vector.load %arg3[%c0_3, %c0_4] : memref<1x32xf32, #tpu.memory_space<vmem>>, vector<1x32xf32>
    %5 = vector.broadcast %4 : vector<1x32xf32> to vector<256x32xf32>
    %6 = arith.mulf %3, %5 : vector<256x32xf32>
    %c0_5 = arith.constant 0 : index
    %c0_6 = arith.constant 0 : index
    %7 = vector.load %arg4[%c0_5, %c0_6] : memref<1x32xf32, #tpu.memory_space<vmem>>, vector<1x32xf32>
    %8 = vector.broadcast %7 : vector<1x32xf32> to vector<256x32xf32>
    %9 = arith.addf %6, %8 : vector<256x32xf32>
    %cst_7 = arith.constant 0.000000e+00 : f32
    %10 = vector.broadcast %cst_7 : f32 to vector<256x32xf32>
    %11 = arith.maximumf %9, %10 : vector<256x32xf32>
    %12 = arith.truncf %11 : vector<256x32xf32> to vector<256x32xbf16>
    %c0_8 = arith.constant 0 : index
    %c0_9 = arith.constant 0 : index
    %13 = vector.load %arg5[%c0_8, %c0_9] : memref<256x32xbf16, #tpu.memory_space<vmem>>, vector<256x32xbf16>
    tpu.vector_store %arg5[%c0_8, %c0_9], %12 {strides = array<i32>} : memref<256x32xbf16, #tpu.memory_space<vmem>>, vector<256x32xbf16>,
    return
  }
  func.func @transform_0(%arg0: i32) -> (i32, i32) {
    %c0_i32 = arith.constant 0 : i32
    %c0_i32_0 = arith.constant 0 : i32
    return %arg0, %c0_i32 : i32, i32
  }
  func.func @transform_1(%arg0: i32) -> (i32, i32) {
    %c0_i32 = arith.constant 0 : i32
    %c0_i32_0 = arith.constant 0 : i32
    %c0_i32_1 = arith.constant 0 : i32
    return %c0_i32, %c0_i32_0 : i32, i32
  }
  func.func @transform_2(%arg0: i32) -> (i32, i32) {
    %c0_i32 = arith.constant 0 : i32
    %c0_i32_0 = arith.constant 0 : i32
    %c0_i32_1 = arith.constant 0 : i32
    return %c0_i32, %c0_i32_0 : i32, i32
  }
  func.func @transform_3(%arg0: i32) -> (i32, i32) {
    %c0_i32 = arith.constant 0 : i32
    %c0_i32_0 = arith.constant 0 : i32
    %c0_i32_1 = arith.constant 0 : i32
    return %c0_i32, %c0_i32_0 : i32, i32
  }
  func.func @transform_4(%arg0: i32) -> (i32, i32) {
    %c0_i32 = arith.constant 0 : i32
    %c0_i32_0 = arith.constant 0 : i32
    return %arg0, %c0_i32 : i32, i32
  }
}

module attributes {stable_mosaic.version = 11 : i64} {
  func.func @_conv23_squeeze_kernel(%arg0: i32, %arg1: i32, %arg2: memref<1x8x18x32xbf16, #tpu.memory_space<vmem>>, %arg3: memref<1x2x18x32xbf16, #tpu.memory_space<vmem>>, %arg4: memref<288x32xbf16, #tpu.memory_space<vmem>>, %arg5: memref<1x32xf32, #tpu.memory_space<vmem>>, %arg6: memref<1x32xf32, #tpu.memory_space<vmem>>, %arg7: memref<32x128xbf16, #tpu.memory_space<vmem>>, %arg8: memref<1x128xf32, #tpu.memory_space<vmem>>, %arg9: memref<1x128xf32, #tpu.memory_space<vmem>>, %arg10: memref<1x128x128xf32, #tpu.memory_space<vmem>>, %arg11: memref<1x1x128xf32, #tpu.memory_space<vmem>>) attributes {dimension_semantics = [#tpu.dimension_semantics<parallel>, #tpu.dimension_semantics<arbitrary>], iteration_bounds = array<i64: 2, 2>, scalar_prefetch = 0 : i64, scratch_operands = 0 : i64, tpu.core_type = #tpu.core_type<tc>, window_params = [{transform_indices = @transform_0, window_bounds = array<i64: 1, 8, 18, 32>}, {transform_indices = @transform_1, window_bounds = array<i64: 1, 2, 18, 32>}, {pipeline_mode = #tpu.pipeline_mode<synchronous>, transform_indices = @transform_2, window_bounds = array<i64: 288, 32>}, {pipeline_mode = #tpu.pipeline_mode<synchronous>, transform_indices = @transform_3, window_bounds = array<i64: 1, 32>}, {pipeline_mode = #tpu.pipeline_mode<synchronous>, transform_indices = @transform_4, window_bounds = array<i64: 1, 32>}, {pipeline_mode = #tpu.pipeline_mode<synchronous>, transform_indices = @transform_5, window_bounds = array<i64: 32, 128>}, {pipeline_mode = #tpu.pipeline_mode<synchronous>, transform_indices = @transform_6, window_bounds = array<i64: 1, 128>}, {pipeline_mode = #tpu.pipeline_mode<synchronous>, transform_indices = @transform_7, window_bounds = array<i64: 1, 128>}, {transform_indices = @transform_8, window_bounds = array<i64: 1, 128, 128>}, {transform_indices = @transform_9, window_bounds = array<i64: 1, 1, 128>}]} {
    %c0 = arith.constant 0 : index
    %c0_0 = arith.constant 0 : index
    %c0_1 = arith.constant 0 : index
    %c0_2 = arith.constant 0 : index
    %0 = vector.load %arg2[%c0, %c0_0, %c0_1, %c0_2] : memref<1x8x18x32xbf16, #tpu.memory_space<vmem>>, vector<1x8x18x32xbf16>
    %1 = vector.shape_cast %0 : vector<1x8x18x32xbf16> to vector<8x18x32xbf16>
    %c0_3 = arith.constant 0 : index
    %c0_4 = arith.constant 0 : index
    %c0_5 = arith.constant 0 : index
    %c0_6 = arith.constant 0 : index
    %2 = vector.load %arg3[%c0_3, %c0_4, %c0_5, %c0_6] : memref<1x2x18x32xbf16, #tpu.memory_space<vmem>>, vector<1x2x18x32xbf16>
    %3 = vector.shape_cast %2 : vector<1x2x18x32xbf16> to vector<2x18x32xbf16>
    %4 = tpu.concatenate %1, %3 in 0 : vector<8x18x32xbf16>, vector<2x18x32xbf16> -> vector<10x18x32xbf16>
    %5 = vector.extract_strided_slice %4 {offsets = [0, 0, 0], sizes = [8, 16, 32], strides = [1, 1, 1]} : vector<10x18x32xbf16> to vector<8x16x32xbf16>
    %6 = vector.extract_strided_slice %4 {offsets = [0, 1, 0], sizes = [8, 16, 32], strides = [1, 1, 1]} : vector<10x18x32xbf16> to vector<8x16x32xbf16>
    %7 = vector.extract_strided_slice %4 {offsets = [0, 2, 0], sizes = [8, 16, 32], strides = [1, 1, 1]} : vector<10x18x32xbf16> to vector<8x16x32xbf16>
    %8 = vector.extract_strided_slice %4 {offsets = [1, 0, 0], sizes = [8, 16, 32], strides = [1, 1, 1]} : vector<10x18x32xbf16> to vector<8x16x32xbf16>
    %9 = vector.extract_strided_slice %4 {offsets = [1, 1, 0], sizes = [8, 16, 32], strides = [1, 1, 1]} : vector<10x18x32xbf16> to vector<8x16x32xbf16>
    %10 = vector.extract_strided_slice %4 {offsets = [1, 2, 0], sizes = [8, 16, 32], strides = [1, 1, 1]} : vector<10x18x32xbf16> to vector<8x16x32xbf16>
    %11 = vector.extract_strided_slice %4 {offsets = [2, 0, 0], sizes = [8, 16, 32], strides = [1, 1, 1]} : vector<10x18x32xbf16> to vector<8x16x32xbf16>
    %12 = vector.extract_strided_slice %4 {offsets = [2, 1, 0], sizes = [8, 16, 32], strides = [1, 1, 1]} : vector<10x18x32xbf16> to vector<8x16x32xbf16>
    %13 = vector.extract_strided_slice %4 {offsets = [2, 2, 0], sizes = [8, 16, 32], strides = [1, 1, 1]} : vector<10x18x32xbf16> to vector<8x16x32xbf16>
    %14 = tpu.concatenate %5, %6, %7, %8, %9, %10, %11, %12, %13 in 2 : vector<8x16x32xbf16>, vector<8x16x32xbf16>, vector<8x16x32xbf16>, vector<8x16x32xbf16>, vector<8x16x32xbf16>, vector<8x16x32xbf16>, vector<8x16x32xbf16>, vector<8x16x32xbf16>, vector<8x16x32xbf16> -> vector<8x16x288xbf16>
    %15 = vector.shape_cast %14 : vector<8x16x288xbf16> to vector<128x288xbf16>
    %c0_7 = arith.constant 0 : index
    %c0_8 = arith.constant 0 : index
    %16 = vector.load %arg4[%c0_7, %c0_8] : memref<288x32xbf16, #tpu.memory_space<vmem>>, vector<288x32xbf16>
    %cst = arith.constant dense<0.000000e+00> : vector<128x32xf32>
    %17 = tpu.matmul %15, %16, %cst {dimension_numbers = #tpu.dot_dimension_numbers<[1], [0], [0], [1], [0, 0, 1, 1], [], []>} : vector<128x288xbf16>, vector<288x32xbf16>, vector<128x32xf32> -> vector<128x32xf32>
    %c0_9 = arith.constant 0 : index
    %c0_10 = arith.constant 0 : index
    %18 = vector.load %arg5[%c0_9, %c0_10] : memref<1x32xf32, #tpu.memory_space<vmem>>, vector<1x32xf32>
    %19 = vector.broadcast %18 : vector<1x32xf32> to vector<128x32xf32>
    %20 = arith.mulf %17, %19 : vector<128x32xf32>
    %c0_11 = arith.constant 0 : index
    %c0_12 = arith.constant 0 : index
    %21 = vector.load %arg6[%c0_11, %c0_12] : memref<1x32xf32, #tpu.memory_space<vmem>>, vector<1x32xf32>
    %22 = vector.broadcast %21 : vector<1x32xf32> to vector<128x32xf32>
    %23 = arith.addf %20, %22 : vector<128x32xf32>
    %cst_13 = arith.constant 0.000000e+00 : f32
    %24 = vector.broadcast %cst_13 : f32 to vector<128x32xf32>
    %25 = arith.maximumf %23, %24 : vector<128x32xf32>
    %26 = arith.truncf %25 : vector<128x32xf32> to vector<128x32xbf16>
    %c0_14 = arith.constant 0 : index
    %c0_15 = arith.constant 0 : index
    %27 = vector.load %arg7[%c0_14, %c0_15] : memref<32x128xbf16, #tpu.memory_space<vmem>>, vector<32x128xbf16>
    %cst_16 = arith.constant dense<0.000000e+00> : vector<128x128xf32>
    %28 = tpu.matmul %26, %27, %cst_16 {dimension_numbers = #tpu.dot_dimension_numbers<[1], [0], [0], [1], [0, 0, 1, 1], [], []>} : vector<128x32xbf16>, vector<32x128xbf16>, vector<128x128xf32> -> vector<128x128xf32>
    %c0_17 = arith.constant 0 : index
    %c0_18 = arith.constant 0 : index
    %29 = vector.load %arg8[%c0_17, %c0_18] : memref<1x128xf32, #tpu.memory_space<vmem>>, vector<1x128xf32>
    %30 = vector.broadcast %29 : vector<1x128xf32> to vector<128x128xf32>
    %31 = arith.mulf %28, %30 : vector<128x128xf32>
    %c0_19 = arith.constant 0 : index
    %c0_20 = arith.constant 0 : index
    %32 = vector.load %arg9[%c0_19, %c0_20] : memref<1x128xf32, #tpu.memory_space<vmem>>, vector<1x128xf32>
    %33 = vector.broadcast %32 : vector<1x128xf32> to vector<128x128xf32>
    %34 = arith.addf %31, %33 : vector<128x128xf32>
    %c0_21 = arith.constant 0 : index
    %c0_22 = arith.constant 0 : index
    %c0_23 = arith.constant 0 : index
    %35 = vector.load %arg10[%c0_21, %c0_22, %c0_23] : memref<1x128x128xf32, #tpu.memory_space<vmem>>, vector<1x128x128xf32>
    %36 = vector.shape_cast %35 : vector<1x128x128xf32> to vector<128x128xf32>
    %37 = vector.shape_cast %34 : vector<128x128xf32> to vector<1x128x128xf32>
    tpu.vector_store %arg10[%c0_21, %c0_22, %c0_23], %37 {strides = array<i32>} : memref<1x128x128xf32, #tpu.memory_space<vmem>>, vector<1x128x128xf32>,
    %c0_i32 = arith.constant 0 : i32
    %38 = arith.cmpi eq, %arg1, %c0_i32 : i32
    %39 = arith.extui %38 : i1 to i32
    %c0_i32_24 = arith.constant 0 : i32
    %40 = arith.cmpi ne, %39, %c0_i32_24 : i32
    scf.if %40 {
      %cst_32 = arith.constant 0.000000e+00 : f32
      %47 = vector.broadcast %cst_32 : f32 to vector<1x1x128xf32>
      %c0_33 = arith.constant 0 : index
      %c0_34 = arith.constant 0 : index
      %c0_35 = arith.constant 0 : index
      %48 = vector.load %arg11[%c0_33, %c0_34, %c0_35] : memref<1x1x128xf32, #tpu.memory_space<vmem>>, vector<1x1x128xf32>
      tpu.vector_store %arg11[%c0_33, %c0_34, %c0_35], %47 {strides = array<i32>} : memref<1x1x128xf32, #tpu.memory_space<vmem>>, vector<1x1x128xf32>,
    } else {
    }
    %c0_25 = arith.constant 0 : index
    %c0_26 = arith.constant 0 : index
    %c0_27 = arith.constant 0 : index
    %41 = vector.load %arg11[%c0_25, %c0_26, %c0_27] : memref<1x1x128xf32, #tpu.memory_space<vmem>>, vector<1x1x128xf32>
    %cst_28 = arith.constant dense<0.000000e+00> : vector<128xf32>
    %42 = vector.multi_reduction <add>, %34, %cst_28 [0] : vector<128x128xf32> to vector<128xf32>
    %43 = vector.shape_cast %42 : vector<128xf32> to vector<1x128xf32>
    %44 = vector.shape_cast %43 : vector<1x128xf32> to vector<1x1x128xf32>
    %45 = arith.addf %41, %44 : vector<1x1x128xf32>
    %c0_29 = arith.constant 0 : index
    %c0_30 = arith.constant 0 : index
    %c0_31 = arith.constant 0 : index
    %46 = vector.load %arg11[%c0_29, %c0_30, %c0_31] : memref<1x1x128xf32, #tpu.memory_space<vmem>>, vector<1x1x128xf32>
    tpu.vector_store %arg11[%c0_29, %c0_30, %c0_31], %45 {strides = array<i32>} : memref<1x1x128xf32, #tpu.memory_space<vmem>>, vector<1x1x128xf32>,
    return
  }
  func.func @transform_0(%arg0: i32, %arg1: i32) -> (i32, i32, i32, i32) {
    %c0_i32 = arith.constant 0 : i32
    %c0_i32_0 = arith.constant 0 : i32
    %c0_i32_1 = arith.constant 0 : i32
    return %arg0, %arg1, %c0_i32, %c0_i32_0 : i32, i32, i32, i32
  }
  func.func @transform_1(%arg0: i32, %arg1: i32) -> (i32, i32, i32, i32) {
    %c1_i32 = arith.constant 1 : i32
    %0 = arith.addi %arg1, %c1_i32 : i32
    %c4_i32 = arith.constant 4 : i32
    %1 = arith.muli %0, %c4_i32 : i32
    %c0_i32 = arith.constant 0 : i32
    %c0_i32_0 = arith.constant 0 : i32
    %c0_i32_1 = arith.constant 0 : i32
    return %arg0, %1, %c0_i32, %c0_i32_0 : i32, i32, i32, i32
  }
  func.func @transform_2(%arg0: i32, %arg1: i32) -> (i32, i32) {
    %c0_i32 = arith.constant 0 : i32
    %c0_i32_0 = arith.constant 0 : i32
    %c0_i32_1 = arith.constant 0 : i32
    return %c0_i32, %c0_i32_0 : i32, i32
  }
  func.func @transform_3(%arg0: i32, %arg1: i32) -> (i32, i32) {
    %c0_i32 = arith.constant 0 : i32
    %c0_i32_0 = arith.constant 0 : i32
    %c0_i32_1 = arith.constant 0 : i32
    return %c0_i32, %c0_i32_0 : i32, i32
  }
  func.func @transform_4(%arg0: i32, %arg1: i32) -> (i32, i32) {
    %c0_i32 = arith.constant 0 : i32
    %c0_i32_0 = arith.constant 0 : i32
    %c0_i32_1 = arith.constant 0 : i32
    return %c0_i32, %c0_i32_0 : i32, i32
  }
  func.func @transform_5(%arg0: i32, %arg1: i32) -> (i32, i32) {
    %c0_i32 = arith.constant 0 : i32
    %c0_i32_0 = arith.constant 0 : i32
    %c0_i32_1 = arith.constant 0 : i32
    return %c0_i32, %c0_i32_0 : i32, i32
  }
  func.func @transform_6(%arg0: i32, %arg1: i32) -> (i32, i32) {
    %c0_i32 = arith.constant 0 : i32
    %c0_i32_0 = arith.constant 0 : i32
    %c0_i32_1 = arith.constant 0 : i32
    return %c0_i32, %c0_i32_0 : i32, i32
  }
  func.func @transform_7(%arg0: i32, %arg1: i32) -> (i32, i32) {
    %c0_i32 = arith.constant 0 : i32
    %c0_i32_0 = arith.constant 0 : i32
    %c0_i32_1 = arith.constant 0 : i32
    return %c0_i32, %c0_i32_0 : i32, i32
  }
  func.func @transform_8(%arg0: i32, %arg1: i32) -> (i32, i32, i32) {
    %c0_i32 = arith.constant 0 : i32
    %c0_i32_0 = arith.constant 0 : i32
    return %arg0, %arg1, %c0_i32 : i32, i32, i32
  }
  func.func @transform_9(%arg0: i32, %arg1: i32) -> (i32, i32, i32) {
    %c0_i32 = arith.constant 0 : i32
    %c0_i32_0 = arith.constant 0 : i32
    %c0_i32_1 = arith.constant 0 : i32
    return %arg0, %c0_i32, %c0_i32_0 : i32, i32, i32
  }
}

module attributes {stable_mosaic.version = 11 : i64} {
  func.func @_se_apply_kernel(%arg0: i32, %arg1: i32, %arg2: memref<1x1x128xf32, #tpu.memory_space<vmem>>, %arg3: memref<128x8xf32, #tpu.memory_space<vmem>>, %arg4: memref<8x128xf32, #tpu.memory_space<vmem>>, %arg5: memref<1x128x128xf32, #tpu.memory_space<vmem>>, %arg6: memref<1x128x128xf32, #tpu.memory_space<vmem>>, %arg7: memref<1x128x128xf32, #tpu.memory_space<vmem>>) attributes {dimension_semantics = [#tpu.dimension_semantics<parallel>, #tpu.dimension_semantics<parallel>], iteration_bounds = array<i64: 2, 2>, scalar_prefetch = 0 : i64, scratch_operands = 0 : i64, tpu.core_type = #tpu.core_type<tc>, window_params = [{transform_indices = @transform_0, window_bounds = array<i64: 1, 1, 128>}, {pipeline_mode = #tpu.pipeline_mode<synchronous>, transform_indices = @transform_1, window_bounds = array<i64: 128, 8>}, {pipeline_mode = #tpu.pipeline_mode<synchronous>, transform_indices = @transform_2, window_bounds = array<i64: 8, 128>}, {transform_indices = @transform_3, window_bounds = array<i64: 1, 128, 128>}, {transform_indices = @transform_4, window_bounds = array<i64: 1, 128, 128>}, {transform_indices = @transform_5, window_bounds = array<i64: 1, 128, 128>}]} {
    %c0 = arith.constant 0 : index
    %c0_0 = arith.constant 0 : index
    %c0_1 = arith.constant 0 : index
    %0 = vector.load %arg2[%c0, %c0_0, %c0_1] : memref<1x1x128xf32, #tpu.memory_space<vmem>>, vector<1x1x128xf32>
    %1 = vector.shape_cast %0 : vector<1x1x128xf32> to vector<1x128xf32>
    %cst = arith.constant 3.906250e-03 : f32
    %2 = vector.broadcast %cst : f32 to vector<1x128xf32>
    %3 = arith.mulf %1, %2 : vector<1x128xf32>
    %c0_2 = arith.constant 0 : index
    %c0_3 = arith.constant 0 : index
    %4 = vector.load %arg3[%c0_2, %c0_3] : memref<128x8xf32, #tpu.memory_space<vmem>>, vector<128x8xf32>
    %cst_4 = arith.constant dense<0.000000e+00> : vector<1x8xf32>
    %5 = tpu.matmul %3, %4, %cst_4 {dimension_numbers = #tpu.dot_dimension_numbers<[1], [0], [0], [1], [0, 0, 1, 1], [], []>} : vector<1x128xf32>, vector<128x8xf32>, vector<1x8xf32> -> vector<1x8xf32>
    %cst_5 = arith.constant 0.000000e+00 : f32
    %6 = vector.broadcast %cst_5 : f32 to vector<1x8xf32>
    %7 = arith.maximumf %5, %6 : vector<1x8xf32>
    %c0_6 = arith.constant 0 : index
    %c0_7 = arith.constant 0 : index
    %8 = vector.load %arg4[%c0_6, %c0_7] : memref<8x128xf32, #tpu.memory_space<vmem>>, vector<8x128xf32>
    %cst_8 = arith.constant dense<0.000000e+00> : vector<1x128xf32>
    %9 = tpu.matmul %7, %8, %cst_8 {dimension_numbers = #tpu.dot_dimension_numbers<[1], [0], [0], [1], [0, 0, 1, 1], [], []>} : vector<1x8xf32>, vector<8x128xf32>, vector<1x128xf32> -> vector<1x128xf32>
    %10 = arith.negf %9 : vector<1x128xf32>
    %11 = math.exp %10 : vector<1x128xf32>
    %cst_9 = arith.constant 1.000000e+00 : f32
    %12 = vector.broadcast %cst_9 : f32 to vector<1x128xf32>
    %13 = arith.addf %12, %11 : vector<1x128xf32>
    %14 = arith.divf %12, %13 : vector<1x128xf32>
    %c0_10 = arith.constant 0 : index
    %c0_11 = arith.constant 0 : index
    %c0_12 = arith.constant 0 : index
    %15 = vector.load %arg5[%c0_10, %c0_11, %c0_12] : memref<1x128x128xf32, #tpu.memory_space<vmem>>, vector<1x128x128xf32>
    %16 = vector.shape_cast %15 : vector<1x128x128xf32> to vector<128x128xf32>
    %17 = vector.broadcast %14 : vector<1x128xf32> to vector<128x128xf32>
    %18 = arith.mulf %16, %17 : vector<128x128xf32>
    %c0_13 = arith.constant 0 : index
    %c0_14 = arith.constant 0 : index
    %c0_15 = arith.constant 0 : index
    %19 = vector.load %arg6[%c0_13, %c0_14, %c0_15] : memref<1x128x128xf32, #tpu.memory_space<vmem>>, vector<1x128x128xf32>
    %20 = vector.shape_cast %19 : vector<1x128x128xf32> to vector<128x128xf32>
    %21 = arith.addf %18, %20 : vector<128x128xf32>
    %cst_16 = arith.constant 0.000000e+00 : f32
    %22 = vector.broadcast %cst_16 : f32 to vector<128x128xf32>
    %23 = arith.maximumf %21, %22 : vector<128x128xf32>
    %c0_17 = arith.constant 0 : index
    %c0_18 = arith.constant 0 : index
    %c0_19 = arith.constant 0 : index
    %24 = vector.load %arg7[%c0_17, %c0_18, %c0_19] : memref<1x128x128xf32, #tpu.memory_space<vmem>>, vector<1x128x128xf32>
    %25 = vector.shape_cast %24 : vector<1x128x128xf32> to vector<128x128xf32>
    %26 = vector.shape_cast %23 : vector<128x128xf32> to vector<1x128x128xf32>
    tpu.vector_store %arg7[%c0_17, %c0_18, %c0_19], %26 {strides = array<i32>} : memref<1x128x128xf32, #tpu.memory_space<vmem>>, vector<1x128x128xf32>,
    return
  }
  func.func @transform_0(%arg0: i32, %arg1: i32) -> (i32, i32, i32) {
    %c0_i32 = arith.constant 0 : i32
    %c0_i32_0 = arith.constant 0 : i32
    %c0_i32_1 = arith.constant 0 : i32
    return %arg0, %c0_i32, %c0_i32_0 : i32, i32, i32
  }
  func.func @transform_1(%arg0: i32, %arg1: i32) -> (i32, i32) {
    %c0_i32 = arith.constant 0 : i32
    %c0_i32_0 = arith.constant 0 : i32
    %c0_i32_1 = arith.constant 0 : i32
    return %c0_i32, %c0_i32_0 : i32, i32
  }
  func.func @transform_2(%arg0: i32, %arg1: i32) -> (i32, i32) {
    %c0_i32 = arith.constant 0 : i32
    %c0_i32_0 = arith.constant 0 : i32
    %c0_i32_1 = arith.constant 0 : i32
    return %c0_i32, %c0_i32_0 : i32, i32
  }
  func.func @transform_3(%arg0: i32, %arg1: i32) -> (i32, i32, i32) {
    %c0_i32 = arith.constant 0 : i32
    %c0_i32_0 = arith.constant 0 : i32
    return %arg0, %arg1, %c0_i32 : i32, i32, i32
  }
  func.func @transform_4(%arg0: i32, %arg1: i32) -> (i32, i32, i32) {
    %c0_i32 = arith.constant 0 : i32
    %c0_i32_0 = arith.constant 0 : i32
    return %arg0, %arg1, %c0_i32 : i32, i32, i32
  }
  func.func @transform_5(%arg0: i32, %arg1: i32) -> (i32, i32, i32) {
    %c0_i32 = arith.constant 0 : i32
    %c0_i32_0 = arith.constant 0 : i32
    return %arg0, %arg1, %c0_i32 : i32, i32, i32
  }
}

</mosaic_0001>

<bundles_post_ra>
// kernel: se_bottleneck_forward.3
= control target key start
LH: loop header
LB: loop body
LE: loop exit
PB: predicated region body
PF: predicated region fallthrough
CT: control target
= control target key end

     0   :  { %9 = vsyncpa [#allocation3], 0  ;;  %s1459_s0 = inlined_call_operand.hbm [shape: f32[512,128], index: 0, kind: input, shape index: {}]   ;;  %s1460_s1 = inlined_call_operand.vmem [shape: bf16[128,32], index: 1, kind: input, shape index: {}]   ;;  %s1461_s2 = inlined_call_operand.vmem [shape: f32[1,32], index: 2, kind: input, shape index: {}]   ;;  %s1462_s3 = inlined_call_operand.vmem [shape: f32[1,32], index: 3, kind: input, shape index: {}]   ;;  %s1463_s4 = inlined_call_operand.vmem [shape: bf16[512,32], index: 4, kind: output, shape index: {}]  }
   0x1   :  { %11 = vsyncpa [#allocation3 + $0x1], 0  ;;  %s1151_s15 = smov 0   ;;  %s1153_s16 = smov 0  }
   0x2   :  { %s1155_s17 = smov 0   ;;  %s1157_s18 = smov 0  }
   0x3 LB: > { %s832_s19 = sadd.s32 4294967295, %s1121_s18   ;;  %s1171_s20 = sadd.s32 1, %s1121_s18   ;;  %s1121_s18 = sphi %s1157_s18, %s1470_s18   ;;  %s1117_s17 = sphi %s1155_s17, %s1469_s17   ;;  %s1113_s16 = sphi %s1153_s16, %s1468_s16   ;;  %s1109_s15 = sphi %s1151_s15, %s1467_s15  }
   0x4   : > { %s21_s21 = ssub.s32 %s1121_s18, %s1171_s20  ;;  %s24_s22 = sadd.s32 1, %s1117_s17 }
   0x5   : > { %p22_p0 = scmp.eq.s32.totalorder %s21_s21, 0  ;;  %p31_p1 = scmp.ne.s32.totalorder %s1117_s17, %s1113_s16 }
   0x6   : > { %p32_p2 = scmp.eq.s32.totalorder %s1121_s18, 0  ;;  %p37_p3 = scmp.ne.s32.totalorder %s1113_s16, %s1109_s15 }
   0x7   : > { %s1181_s23 = scalar_select %p22_p0, %s1117_s17, %s24_s22  }
   0x8   : > { %p33_p4 = por %p32_p2, %p31_p1  ;;  %p38_p5 = scmp.eq.s32.totalorder %s832_s19, 0 }
   0x9   : > { %p1014_p6 = scmp.lt.s32.totalorder %s1121_s18, 2  ;;  %s159_s25 = sand.u32 1, %s1117_s17  }
   0xa   : > { %p1186_p7 = por %p38_p5, %p37_p3  ;;  %s836_s26 = sshll.u32 %s159_s25, 8 }
   0xb   : > { %s887_s27 = sshll.u32 %s1121_s18, 12  ;;  %s163_s5 = scalar_lea.vmem [#allocation2], %s836_s26 }
   0xc   : > { %s1195_s30 = scalar_lea.hbm %s1459_s0, %s887_s27  ;;  %s170_s6 = sshll.u32 %s163_s5, 4  ;;  %s1197_s6 = int_to_ptr.vmem [resolvable:$true] %s170_s6 }
   0xd   : > { %p1199_p8 = pnand %p1014_p6, %p33_p4  ;;  %s1204_s8 = scalar_lea.sflag [#allocation3], %s159_s25 }
   0xe   : > { %s1057_s9 = scalar_lea.hbm %s1195_s30, 4096  ;;  %s1062_s12 = scalar_lea.hbm %s1459_s0, 8192 }
   0xf   : > { %p1058_p10 = scmp.ne.s32.totalorder %s1195_s30, %s1057_s9  ;;  %p1059_p11 = pneg %p1199_p8 }
  0x10   : > { %p1063_p0 = scmp.lt.u32.totalorder %s1195_s30, %s1459_s0  ;;  %p1064_p1 = scmp.lt.u32.totalorder %s1062_s12, %s1057_s9 }
  0x11   : > { %p1060_p12 = pnand %p1059_p11, %p1058_p10  ;;  %p1066_p3 = scmp.lt.u32.totalorder %s1057_s9, %s1195_s30 }
  0x12   : > { %p1065_p2 = por %p1064_p1, %p1063_p0 }
  0x13   : > { %p1061_p13 = pneg %p1060_p12 }
  0x14   : > { %p1067_p4 = por %p1066_p3, %p1065_p2 }
  0x16   : > { %p1068_p5 = pnand %p1067_p4, %p1061_p13 }
  0x18   : > { %1071 = shalt.err (!%p1068_p5)
}
  0x19   : > { %s1072_s15 = scalar_lea.vmem %s1197_s6, 4096  ;;  %s1123_s21 = smov [#allocation2]  }
  0x1a   : > { %p1073_p6 = scmp.ne.s32.totalorder %s1197_s6, %s1072_s15  ;;  %s1077_s22 = sshll.u32 %s1123_s21, 4  ;;  %s1078_s22 = int_to_ptr.vmem [resolvable:$false] %s1077_s22 }
  0x1b   : > { %s1079_s25 = scalar_lea.vmem %s1078_s22, 8192  ;;  %p1080_p9 = scmp.lt.s32.totalorder %s1197_s6, %s1078_s22 }
  0x1c   : > { %p1075_p10 = pnand %p1073_p6, %p1059_p11  ;;  %p1081_p0 = scmp.lt.s32.totalorder %s1079_s25, %s1072_s15 }
  0x1e   : > { %p1076_p12 = pneg %p1075_p10  ;;  %p1082_p1 = por %p1081_p0, %p1080_p9 }
  0x20   : > { %p1083_p2 = pnand %p1082_p1, %p1076_p12 }
  0x22   : > { %1086 = shalt.err (!%p1083_p2)
}
  0x23   : > { %s1124_s26 = smov 128   ;;  %s1125_s27 = smov 8  }
  0x24   : > { %1013 = dma.hbm_to_vmem [thread:$0]  (!%p1199_p8), %s1195_s30, 4096, %s1197_s6, %s1204_s8, %s1124_s26, %s1124_s26, %s1125_s27  }
  0x25   : > { %p178_p11 = scmp.lt.s32.totalorder %s1121_s18, 3  ;;  %p1466_p13 = scmp.ge.s32.totalorder %s1121_s18, 1 }
  0x27   : > { %p179_p3 = pnand %p1466_p13, %p178_p11 }
  0x28   : > { %s184_s28 = sand.u32 (!%p179_p3), 1, %s1113_s16  }
  0x29   : > { %182 = sbr.rel (%p179_p3) target bundleno = 333 (0x14d), region = 36  ;;  %s840_s29 = sshll.u32 (!%p179_p3), %s184_s28, 8 }
  0x2a   : > { %s185_s5 = scalar_lea.sflag (!%p179_p3), [#allocation3], %s184_s28  ;;  %s1236_s9 = scalar_lea.vmem (!%p179_p3), [#allocation2], %s840_s29 }
  0x30   : > { %1104 = dma.done.wait (%p1186_p7), %s185_s5, 4096  }
  0x31   : > { %1106 = vsyncadd (%p1186_p7), %s185_s5, 4294963200  ;;  %v1049_v0 = vld [vmem:[%s1460_s1] sm:$0xff]   ;;  %v1050_v1 = vld [vmem:[%s1460_s1 + $0x8] sm:$0xff]   ;;  %s841_s28 = sshll.u32 %s832_s19, 5  ;;  %vm732_vm0 = vcmask 257024  }
  0x32   : > { %944 = vmatprep.subr.bf16.mxu0 %v1049_v0  ;;  %992 = vmatprep.subr.bf16.mxu1 %v1049_v0  ;;  %v1051_v2 = vld [vmem:[%s1460_s1 + $0x10] sm:$0xff]   ;;  %v1052_v3 = vld [vmem:[%s1460_s1 + $0x18] sm:$0xff]   ;;  %v221_v4 = vld [vmem:[%s1236_s9] sm:$0xff]  ;;  %p215_p7 = scmp.lt.s32.totalorder %s841_s28, 63 }
  0x33   : > { %945 = vmatpush3.bf16.msra.mxu0 %v1049_v0  ;;  %1000 = vmatpush3.bf16.msra.mxu1 %v1049_v0  ;;  %v222_v5 = vld [vmem:[%s1236_s9 + $0x8] sm:$0xff]  ;;  %v237_v6 = vld [vmem:[%s1236_s9 + $0x80] sm:$0xff]  ;;  %v1055_v12 = vld [vmem:[%s1460_s1 + $0x30] sm:$0xff]  }
  0x34   : > { %946 = vmatprep.subr.bf16.mxu0 %v1050_v1  ;;  %993 = vmatprep.subr.bf16.mxu1 %v1050_v1  ;;  %v253_v7 = vpack.c.bf16 %v222_v5, %v221_v4  ;;  %v238_v8 = vld [vmem:[%s1236_s9 + $0x88] sm:$0xff]  ;;  %v1053_v10 = vld [vmem:[%s1460_s1 + $0x20] sm:$0xff]   ;;  %v1056_v13 = vld [vmem:[%s1460_s1 + $0x38] sm:$0xff]   ;;  %s1472_s28 = smov (!%p215_p7, %s841_s28), 63 }
  0x35   : > { %v261_v9 = vpack.c.bf16 %v238_v8, %v237_v6  ;;  %v1054_v11 = vld [vmem:[%s1460_s1 + $0x28] sm:$0xff]   ;;  %v223_v14 = vld [vmem:[%s1236_s9 + $0x10] sm:$0xff]  ;;  %v224_v15 = vld [vmem:[%s1236_s9 + $0x18] sm:$0xff]  ;;  %s842_s18 = sshll.u32 %s1472_s28, 2 }
  0x36   : > { %960 = vmatprep.mubr.bf16.mxu0 %v253_v7  ;;  %v239_v16 = vld [vmem:[%s1236_s9 + $0x90] sm:$0xff]  ;;  %v240_v17 = vld [vmem:[%s1236_s9 + $0x98] sm:$0xff]  ;;  %v225_v18 = vld [vmem:[%s1236_s9 + $0x20] sm:$0xff]  ;;  %v254_v22 = vpack.c.bf16 %v224_v15, %v223_v14  ;;  %s1330_s30 = scalar_lea.vmem %s1463_s4, %s842_s18 }
  0x37   : > { %947 = vmatpush3.bf16.msra.mxu0 %v1050_v1  ;;  %1001 = vmatpush3.bf16.msra.mxu1 %v1050_v1  ;;  %v226_v19 = vld [vmem:[%s1236_s9 + $0x28] sm:$0xff]  ;;  %v241_v20 = vld [vmem:[%s1236_s9 + $0xa0] sm:$0xff]  ;;  %v262_v23 = vpack.c.bf16 %v240_v17, %v239_v16  ;;  %v227_v26 = vld [vmem:[%s1236_s9 + $0x30] sm:$0xff] }
  0x38   : > { %948 = vmatprep.subr.bf16.mxu0 %v1051_v2  ;;  %994 = vmatprep.subr.bf16.mxu1 %v1051_v2  ;;  %v242_v21 = vld [vmem:[%s1236_s9 + $0xa8] sm:$0xff]  ;;  %v255_v24 = vpack.c.bf16 %v226_v19, %v225_v18  ;;  %v228_v27 = vld [vmem:[%s1236_s9 + $0x38] sm:$0xff]  ;;  %v243_v28 = vld [vmem:[%s1236_s9 + $0xb0] sm:$0xff] }
  0x39   : > { %976 = vmatprep.mubr.bf16.mxu1 %v261_v9  ;;  %v263_v25 = vpack.c.bf16 %v242_v21, %v241_v20  ;;  %v244_v29 = vld [vmem:[%s1236_s9 + $0xb8] sm:$0xff]  ;;  %v229_v30 = vld [vmem:[%s1236_s9 + $0x40] sm:$0xff]  ;;  %v230_v31 = vld [vmem:[%s1236_s9 + $0x48] sm:$0xff]  ;;  %v256_v34 = vpack.c.bf16 %v228_v27, %v227_v26 }
  0x3a   : > { %v245_v32 = vld [vmem:[%s1236_s9 + $0xc0] sm:$0xff]  ;;  %v246_v33 = vld [vmem:[%s1236_s9 + $0xc8] sm:$0xff]  ;;  %v264_v35 = vpack.c.bf16 %v244_v29, %v243_v28  ;;  %v257_v36 = vpack.c.bf16 %v230_v31, %v229_v30  ;;  %v231_v38 = vld [vmem:[%s1236_s9 + $0x50] sm:$0xff] }
  0x3b   : > { %949 = vmatpush3.bf16.msra.mxu0 %v1051_v2  ;;  %1002 = vmatpush3.bf16.msra.mxu1 %v1051_v2  ;;  %v265_v37 = vpack.c.bf16 %v246_v33, %v245_v32  ;;  %v232_v39 = vld [vmem:[%s1236_s9 + $0x58] sm:$0xff]  ;;  %v247_v40 = vld [vmem:[%s1236_s9 + $0xd0] sm:$0xff]  ;;  %v233_v42 = vld [vmem:[%s1236_s9 + $0x60] sm:$0xff] }
  0x3c   : > { %950 = vmatprep.subr.bf16.mxu0 %v1052_v3  ;;  %995 = vmatprep.subr.bf16.mxu1 %v1052_v3  ;;  %v248_v41 = vld [vmem:[%s1236_s9 + $0xd8] sm:$0xff]  ;;  %v234_v43 = vld [vmem:[%s1236_s9 + $0x68] sm:$0xff]  ;;  %v249_v44 = vld [vmem:[%s1236_s9 + $0xe0] sm:$0xff]  ;;  %v258_v46 = vpack.c.bf16 %v232_v39, %v231_v38 }
  0x3d   : > { %v250_v45 = vld [vmem:[%s1236_s9 + $0xe8] sm:$0xff]  ;;  %v266_v47 = vpack.c.bf16 %v248_v41, %v247_v40  ;;  %v259_v48 = vpack.c.bf16 %v234_v43, %v233_v42  ;;  %v235_v50 = vld [vmem:[%s1236_s9 + $0x70] sm:$0xff]  ;;  %v236_v51 = vld [vmem:[%s1236_s9 + $0x78] sm:$0xff] }
  0x3e   : > { %v267_v49 = vpack.c.bf16 %v250_v45, %v249_v44  ;;  %v251_v52 = vld [vmem:[%s1236_s9 + $0xf0] sm:$0xff]  ;;  %v252_v53 = vld [vmem:[%s1236_s9 + $0xf8] sm:$0xff]  ;;  %v260_v54 = vpack.c.bf16 %v236_v51, %v235_v50  ;;  %v1303_v56 = vld [vmem:[%s1461_s2] ss:$0 sm:$0xff] }
  0x3f   : > { %951 = vmatpush3.bf16.msra.mxu0 %v1052_v3  ;;  %1003 = vmatpush3.bf16.msra.mxu1 %v1052_v3  ;;  %v268_v55 = vpack.c.bf16 %v252_v53, %v251_v52  ;;  %v1310_v58 = vld [vmem:[%s1462_s3] ss:$0 sm:$0xff] }
  0x40   : > { %952 = vmatprep.subr.bf16.mxu0 %v1053_v10  ;;  %996 = vmatprep.subr.bf16.mxu1 %v1053_v10 }
  0x43   : > { %953 = vmatpush3.bf16.msra.mxu0 %v1053_v10  ;;  %1004 = vmatpush3.bf16.msra.mxu1 %v1053_v10 }
  0x44   : > { %954 = vmatprep.subr.bf16.mxu0 %v1054_v11  ;;  %997 = vmatprep.subr.bf16.mxu1 %v1054_v11 }
  0x47   : > { %955 = vmatpush3.bf16.msra.mxu0 %v1054_v11  ;;  %1005 = vmatpush3.bf16.msra.mxu1 %v1054_v11 }
  0x48   : > { %956 = vmatprep.subr.bf16.mxu0 %v1055_v12  ;;  %998 = vmatprep.subr.bf16.mxu1 %v1055_v12 }
  0x4b   : > { %957 = vmatpush3.bf16.msra.mxu0 %v1055_v12  ;;  %1006 = vmatpush3.bf16.msra.mxu1 %v1055_v12 }
  0x4c   : > { %958 = vmatprep.subr.bf16.mxu0 %v1056_v13  ;;  %999 = vmatprep.subr.bf16.mxu1 %v1056_v13 }
  0x4f   : > { %959 = vmatpush3.bf16.msra.mxu0 %v1056_v13  ;;  %1007 = vmatpush3.bf16.msra.mxu1 %v1056_v13 }
  0x52   : > { %961 = vmatmul.mubr.bf16.vlgmr.msra.gmra.mrb[0].mxu0 %v254_v22  ;;  %977 = vmatmul.mubr.bf16.vlgmr.msra.gmra.mrb[0].mxu1 %v262_v23 }
  0x53   : > { %964 = vmatprep.mubr.bf16.mxu0 %v255_v24  ;;  %980 = vmatprep.mubr.bf16.mxu1 %v263_v25 }
  0x5a   : > { %965 = vmatmul.mubr.bf16.gmra.mrb[4].mxu0 %v256_v34  ;;  %981 = vmatmul.mubr.bf16.gmra.mrb[4].mxu1 %v264_v35 }
  0x5b   : > { %968 = vmatprep.mubr.bf16.mxu0 %v257_v36  ;;  %984 = vmatprep.mubr.bf16.mxu1 %v265_v37 }
  0x62   : > { %969 = vmatmul.mubr.bf16.gmra.mrb[8].mxu0 %v258_v46  ;;  %985 = vmatmul.mubr.bf16.gmra.mrb[8].mxu1 %v266_v47 }
  0x63   : > { %972 = vmatprep.mubr.bf16.mxu0 %v259_v48  ;;  %988 = vmatprep.mubr.bf16.mxu1 %v267_v49 }
  0x6a   : > { %973 = vmatmul.mubr.bf16.gmra.mrb[12].mxu0 %v260_v54  ;;  %989 = vmatmul.mubr.bf16.gmra.mrb[12].mxu1 %v268_v55 }
 0x125   : > { %v962_v57 = vpop.f32.mrb[0].mxu0  ;;  %v978_v59 = vpop.f32.mrb[0].mxu1 }
 0x126   : > { %v503_v60 = vmul.f32 %v962_v57, %v1303_v56  ;;  %v519_v61 = vmul.f32 %v978_v59, %v1303_v56  ;;  %v367_v62 = vpop.f32.mrb[1].mxu0  ;;  %v431_v63 = vpop.f32.mrb[1].mxu1 }
 0x127   : > { %v501_v0 = vmul.f32 %v1303_v56, %v367_v62  ;;  %v517_v1 = vmul.f32 %v1303_v56, %v431_v63  ;;  %v963_v2 = vpop.f32.mrb[2].mxu0  ;;  %v979_v3 = vpop.f32.mrb[2].mxu1 }
 0x128   : > { %v542_v4 = vadd.f32 %v1310_v58, %v503_v60  ;;  %v558_v5 = vadd.f32 %v1310_v58, %v519_v61  ;;  %v504_v6 = vmul.f32 %v963_v2, %v1303_v56  ;;  %v520_v7 = vmul.f32 %v979_v3, %v1303_v56  ;;  %v370_v8 = vpop.f32.mrb[3].mxu0  ;;  %v434_v9 = vpop.f32.mrb[3].mxu1 }
 0x129   : > { %v540_v10 = vadd.f32 %v1310_v58, %v501_v0  ;;  %v556_v11 = vadd.f32 %v1310_v58, %v517_v1  ;;  %v502_v12 = vmul.f32 %v1303_v56, %v370_v8  ;;  %v518_v13 = vmul.f32 %v1303_v56, %v434_v9 }
 0x12a   : > { %v574_v14 = vmax.f32 %v542_v4, 0.0  ;;  %v590_v15 = vmax.f32 %v558_v5, 0.0  ;;  %v543_v16 = vadd.f32 %v1310_v58, %v504_v6  ;;  %v559_v17 = vadd.f32 %v1310_v58, %v520_v7 }
 0x12b   : > { %v572_v18 = vmax.f32 %v540_v10, 0.0  ;;  %v588_v19 = vmax.f32 %v556_v11, 0.0  ;;  %v541_v20 = vadd.f32 %v1310_v58, %v502_v12  ;;  %v557_v21 = vadd.f32 %v1310_v58, %v518_v13 }
 0x12c   : > { %v890_v22 = vpack.c.bf16 %v574_v14, %v574_v14  ;;  %v906_v23 = vpack.c.bf16 %v590_v15, %v590_v15  ;;  %v575_v24 = vmax.f32 %v543_v16, 0.0  ;;  %v591_v25 = vmax.f32 %v559_v17, 0.0 }
 0x12d   : > { %v888_v26 = vpack.c.bf16 %v572_v18, %v572_v18  ;;  %v904_v27 = vpack.c.bf16 %v588_v19, %v588_v19  ;;  %v573_v28 = vmax.f32 %v541_v20, 0.0  ;;  %v589_v29 = vmax.f32 %v557_v21, 0.0  ;;  %v966_v30 = vpop.f32.mrb[4].mxu0  ;;  %v982_v31 = vpop.f32.mrb[4].mxu1 }
 0x12e   : > { %735 = vst.msk [vmem:[%s1330_s30 + $0x8] sm:$0xf] %vm732_vm0, %v890_v22  ;;  %751 = vst.msk [vmem:[%s1330_s30 + $0x48] sm:$0xf] %vm732_vm0, %v906_v23  ;;  %v891_v32 = vpack.c.bf16 %v575_v24, %v575_v24  ;;  %v907_v33 = vpack.c.bf16 %v591_v25, %v591_v25  ;;  %v507_v34 = vmul.f32 %v966_v30, %v1303_v56  ;;  %v383_v36 = vpop.f32.mrb[5].mxu0  ;;  %v447_v37 = vpop.f32.mrb[5].mxu1 }
 0x12f   : > { %v523_v35 = vmul.f32 %v982_v31, %v1303_v56  ;;  %733 = vst.msk [vmem:[%s1330_s30] sm:$0xf] %vm732_vm0, %v888_v26  ;;  %749 = vst.msk [vmem:[%s1330_s30 + $0x40] sm:$0xf] %vm732_vm0, %v904_v27  ;;  %v889_v38 = vpack.c.bf16 %v573_v28, %v573_v28  ;;  %v905_v39 = vpack.c.bf16 %v589_v29, %v589_v29  ;;  %v967_v42 = vpop.f32.mrb[6].mxu0  ;;  %v983_v43 = vpop.f32.mrb[6].mxu1 }
 0x130   : > { %v505_v40 = vmul.f32 %v1303_v56, %v383_v36  ;;  %v521_v41 = vmul.f32 %v1303_v56, %v447_v37  ;;  %736 = vst.msk [vmem:[%s1330_s30 + $0xc] sm:$0xf] %vm732_vm0, %v891_v32  ;;  %752 = vst.msk [vmem:[%s1330_s30 + $0x4c] sm:$0xf] %vm732_vm0, %v907_v33  ;;  %v546_v44 = vadd.f32 %v1310_v58, %v507_v34  ;;  %v386_v48 = vpop.f32.mrb[7].mxu0  ;;  %v450_v49 = vpop.f32.mrb[7].mxu1 }
 0x131   : > { %v562_v45 = vadd.f32 %v1310_v58, %v523_v35  ;;  %v508_v46 = vmul.f32 %v967_v42, %v1303_v56  ;;  %v524_v47 = vmul.f32 %v983_v43, %v1303_v56  ;;  %734 = vst.msk [vmem:[%s1330_s30 + $0x4] sm:$0xf] %vm732_vm0, %v889_v38  ;;  %750 = vst.msk [vmem:[%s1330_s30 + $0x44] sm:$0xf] %vm732_vm0, %v905_v39 }
 0x132   : > { %v544_v50 = vadd.f32 %v1310_v58, %v505_v40  ;;  %v560_v51 = vadd.f32 %v1310_v58, %v521_v41  ;;  %v506_v52 = vmul.f32 %v1303_v56, %v386_v48  ;;  %v522_v53 = vmul.f32 %v1303_v56, %v450_v49 }
 0x133   : > { %v578_v54 = vmax.f32 %v546_v44, 0.0  ;;  %v594_v55 = vmax.f32 %v562_v45, 0.0  ;;  %v547_v57 = vadd.f32 %v1310_v58, %v508_v46  ;;  %v563_v59 = vadd.f32 %v1310_v58, %v524_v47 }
 0x134   : > { %v576_v60 = vmax.f32 %v544_v50, 0.0  ;;  %v592_v61 = vmax.f32 %v560_v51, 0.0  ;;  %v545_v62 = vadd.f32 %v1310_v58, %v506_v52  ;;  %v561_v63 = vadd.f32 %v1310_v58, %v522_v53 }
 0x135   : > { %v894_v0 = vpack.c.bf16 %v578_v54, %v578_v54  ;;  %v910_v1 = vpack.c.bf16 %v594_v55, %v594_v55  ;;  %v579_v2 = vmax.f32 %v547_v57, 0.0  ;;  %v595_v3 = vmax.f32 %v563_v59, 0.0  ;;  %v970_v8 = vpop.f32.mrb[8].mxu0  ;;  %v986_v9 = vpop.f32.mrb[8].mxu1 }
 0x136   : > { %v892_v4 = vpack.c.bf16 %v576_v60, %v576_v60  ;;  %v908_v5 = vpack.c.bf16 %v592_v61, %v592_v61  ;;  %v577_v6 = vmax.f32 %v545_v62, 0.0  ;;  %v593_v7 = vmax.f32 %v561_v63, 0.0  ;;  %v399_v14 = vpop.f32.mrb[9].mxu0  ;;  %v463_v15 = vpop.f32.mrb[9].mxu1 }
 0x137   : > { %739 = vst.msk [vmem:[%s1330_s30 + $0x18] sm:$0xf] %vm732_vm0, %v894_v0  ;;  %755 = vst.msk [vmem:[%s1330_s30 + $0x58] sm:$0xf] %vm732_vm0, %v910_v1  ;;  %v895_v10 = vpack.c.bf16 %v579_v2, %v579_v2  ;;  %v911_v11 = vpack.c.bf16 %v595_v3, %v595_v3  ;;  %v511_v12 = vmul.f32 %v970_v8, %v1303_v56  ;;  %v971_v20 = vpop.f32.mrb[10].mxu0  ;;  %v987_v21 = vpop.f32.mrb[10].mxu1 }
 0x138   : > { %v527_v13 = vmul.f32 %v986_v9, %v1303_v56  ;;  %737 = vst.msk [vmem:[%s1330_s30 + $0x10] sm:$0xf] %vm732_vm0, %v892_v4  ;;  %753 = vst.msk [vmem:[%s1330_s30 + $0x50] sm:$0xf] %vm732_vm0, %v908_v5  ;;  %v893_v16 = vpack.c.bf16 %v577_v6, %v577_v6  ;;  %v909_v17 = vpack.c.bf16 %v593_v7, %v593_v7  ;;  %v402_v26 = vpop.f32.mrb[11].mxu0  ;;  %v466_v27 = vpop.f32.mrb[11].mxu1 }
 0x139   : > { %v509_v18 = vmul.f32 %v1303_v56, %v399_v14  ;;  %v525_v19 = vmul.f32 %v1303_v56, %v463_v15  ;;  %740 = vst.msk [vmem:[%s1330_s30 + $0x1c] sm:$0xf] %vm732_vm0, %v895_v10  ;;  %756 = vst.msk [vmem:[%s1330_s30 + $0x5c] sm:$0xf] %vm732_vm0, %v911_v11  ;;  %v550_v22 = vadd.f32 %v1310_v58, %v511_v12 }
 0x13a   : > { %v566_v23 = vadd.f32 %v1310_v58, %v527_v13  ;;  %v512_v24 = vmul.f32 %v971_v20, %v1303_v56  ;;  %v528_v25 = vmul.f32 %v987_v21, %v1303_v56  ;;  %738 = vst.msk [vmem:[%s1330_s30 + $0x14] sm:$0xf] %vm732_vm0, %v893_v16  ;;  %754 = vst.msk [vmem:[%s1330_s30 + $0x54] sm:$0xf] %vm732_vm0, %v909_v17 }
 0x13b   : > { %v548_v28 = vadd.f32 %v1310_v58, %v509_v18  ;;  %v564_v29 = vadd.f32 %v1310_v58, %v525_v19  ;;  %v510_v30 = vmul.f32 %v1303_v56, %v402_v26  ;;  %v526_v31 = vmul.f32 %v1303_v56, %v466_v27 }
 0x13c   : > { %v582_v32 = vmax.f32 %v550_v22, 0.0  ;;  %v598_v33 = vmax.f32 %v566_v23, 0.0  ;;  %v551_v34 = vadd.f32 %v1310_v58, %v512_v24  ;;  %v567_v35 = vadd.f32 %v1310_v58, %v528_v25 }
 0x13d   : > { %v580_v36 = vmax.f32 %v548_v28, 0.0  ;;  %v596_v37 = vmax.f32 %v564_v29, 0.0  ;;  %v549_v38 = vadd.f32 %v1310_v58, %v510_v30  ;;  %v565_v39 = vadd.f32 %v1310_v58, %v526_v31  ;;  %v974_v48 = vpop.f32.mrb[12].mxu0  ;;  %v990_v49 = vpop.f32.mrb[12].mxu1 }
 0x13e   : > { %v898_v40 = vpack.c.bf16 %v582_v32, %v582_v32  ;;  %v914_v41 = vpack.c.bf16 %v598_v33, %v598_v33  ;;  %v583_v42 = vmax.f32 %v551_v34, 0.0  ;;  %v599_v43 = vmax.f32 %v567_v35, 0.0  ;;  %v415_v54 = vpop.f32.mrb[13].mxu0  ;;  %v479_v55 = vpop.f32.mrb[13].mxu1 }
 0x13f   : > { %v896_v44 = vpack.c.bf16 %v580_v36, %v580_v36  ;;  %v912_v45 = vpack.c.bf16 %v596_v37, %v596_v37  ;;  %v581_v46 = vmax.f32 %v549_v38, 0.0  ;;  %v597_v47 = vmax.f32 %v565_v39, 0.0  ;;  %v975_v62 = vpop.f32.mrb[14].mxu0  ;;  %v991_v63 = vpop.f32.mrb[14].mxu1 }
 0x140   : > { %743 = vst.msk [vmem:[%s1330_s30 + $0x28] sm:$0xf] %vm732_vm0, %v898_v40  ;;  %759 = vst.msk [vmem:[%s1330_s30 + $0x68] sm:$0xf] %vm732_vm0, %v914_v41  ;;  %v899_v50 = vpack.c.bf16 %v583_v42, %v583_v42  ;;  %v915_v51 = vpack.c.bf16 %v599_v43, %v599_v43  ;;  %v515_v52 = vmul.f32 %v974_v48, %v1303_v56  ;;  %v418_v4 = vpop.f32.mrb[15].mxu0  ;;  %v482_v5 = vpop.f32.mrb[15].mxu1 }
 0x141   : > { %v531_v53 = vmul.f32 %v990_v49, %v1303_v56  ;;  %741 = vst.msk [vmem:[%s1330_s30 + $0x20] sm:$0xf] %vm732_vm0, %v896_v44  ;;  %757 = vst.msk [vmem:[%s1330_s30 + $0x60] sm:$0xf] %vm732_vm0, %v912_v45  ;;  %v897_v57 = vpack.c.bf16 %v581_v46, %v581_v46  ;;  %v913_v59 = vpack.c.bf16 %v597_v47, %v597_v47 }
 0x142   : > { %v513_v60 = vmul.f32 %v1303_v56, %v415_v54  ;;  %v529_v61 = vmul.f32 %v1303_v56, %v479_v55  ;;  %744 = vst.msk [vmem:[%s1330_s30 + $0x2c] sm:$0xf] %vm732_vm0, %v899_v50  ;;  %760 = vst.msk [vmem:[%s1330_s30 + $0x6c] sm:$0xf] %vm732_vm0, %v915_v51  ;;  %v554_v0 = vadd.f32 %v1310_v58, %v515_v52 }
 0x143   : > { %v570_v1 = vadd.f32 %v1310_v58, %v531_v53  ;;  %v516_v2 = vmul.f32 %v975_v62, %v1303_v56  ;;  %v532_v3 = vmul.f32 %v991_v63, %v1303_v56  ;;  %742 = vst.msk [vmem:[%s1330_s30 + $0x24] sm:$0xf] %vm732_vm0, %v897_v57  ;;  %758 = vst.msk [vmem:[%s1330_s30 + $0x64] sm:$0xf] %vm732_vm0, %v913_v59 }
 0x144   : > { %v552_v6 = vadd.f32 %v1310_v58, %v513_v60  ;;  %v568_v7 = vadd.f32 %v1310_v58, %v529_v61  ;;  %v514_v8 = vmul.f32 %v1303_v56, %v418_v4  ;;  %v530_v9 = vmul.f32 %v1303_v56, %v482_v5 }
 0x145   : > { %v586_v10 = vmax.f32 %v554_v0, 0.0  ;;  %v602_v11 = vmax.f32 %v570_v1, 0.0  ;;  %v555_v12 = vadd.f32 %v1310_v58, %v516_v2  ;;  %v571_v13 = vadd.f32 %v1310_v58, %v532_v3 }
 0x146   : > { %v584_v14 = vmax.f32 %v552_v6, 0.0  ;;  %v600_v15 = vmax.f32 %v568_v7, 0.0  ;;  %v553_v16 = vadd.f32 %v1310_v58, %v514_v8  ;;  %v569_v17 = vadd.f32 %v1310_v58, %v530_v9 }
 0x147   : > { %v902_v18 = vpack.c.bf16 %v586_v10, %v586_v10  ;;  %v918_v19 = vpack.c.bf16 %v602_v11, %v602_v11  ;;  %v587_v56 = vmax.f32 %v555_v12, 0.0  ;;  %v603_v20 = vmax.f32 %v571_v13, 0.0 }
 0x148   : > { %v900_v21 = vpack.c.bf16 %v584_v14, %v584_v14  ;;  %v916_v22 = vpack.c.bf16 %v600_v15, %v600_v15  ;;  %v585_v23 = vmax.f32 %v553_v16, 0.0  ;;  %v601_v24 = vmax.f32 %v569_v17, 0.0 }
 0x149   : > { %747 = vst.msk [vmem:[%s1330_s30 + $0x38] sm:$0xf] %vm732_vm0, %v902_v18  ;;  %763 = vst.msk [vmem:[%s1330_s30 + $0x78] sm:$0xf] %vm732_vm0, %v918_v19  ;;  %v903_v25 = vpack.c.bf16 %v587_v56, %v587_v56  ;;  %v919_v26 = vpack.c.bf16 %v603_v20, %v603_v20 }
 0x14a   : > { %745 = vst.msk [vmem:[%s1330_s30 + $0x30] sm:$0xf] %vm732_vm0, %v900_v21  ;;  %761 = vst.msk [vmem:[%s1330_s30 + $0x70] sm:$0xf] %vm732_vm0, %v916_v22  ;;  %v901_v58 = vpack.c.bf16 %v585_v23, %v585_v23  ;;  %v917_v27 = vpack.c.bf16 %v601_v24, %v601_v24 }
 0x14b   : > { %748 = vst.msk [vmem:[%s1330_s30 + $0x3c] sm:$0xf] %vm732_vm0, %v903_v25  ;;  %764 = vst.msk [vmem:[%s1330_s30 + $0x7c] sm:$0xf] %vm732_vm0, %v919_v26 }
 0x14c   : > { %746 = vst.msk [vmem:[%s1330_s30 + $0x34] sm:$0xf] %vm732_vm0, %v901_v58  ;;  %762 = vst.msk [vmem:[%s1330_s30 + $0x74] sm:$0xf] %vm732_vm0, %v917_v27 }
 0x14d PF: > { %p14_p8 = scmp.ge.s32.totalorder %s1171_s20, 4   ;;  %s1467_s15 = smov %s1113_s16 }
 0x14e   : > { %s1468_s16 = smov %s1117_s17  ;;  %s1469_s17 = smov %s1181_s23 }
 0x14f   : > { %s1470_s18 = smov %s1171_s20  ;;  %16 = sbr.rel (!%p14_p8) target bundleno = 3 (0x3), region = 76 }
 0x156   :  { %787 = vsyncpa [#allocation3], 1 }
 0x157   :  { %789 = vsyncpa [#allocation3 + $0x1], 1 }

// kernel: se_bottleneck_forward.5
= control target key start
LH: loop header
LB: loop body
LE: loop exit
PB: predicated region body
PF: predicated region fallthrough
CT: control target
= control target key end

     0   :  { %s922_s18 = smov 0   ;;  %s924_s19 = smov 0   ;;  %s1082_s0 = inlined_call_operand.vmem [shape: f32[2,1,128], index: 0, kind: input, shape index: {}]   ;;  %s1083_s1 = inlined_call_operand.vmem [shape: f32[128,8], index: 1, kind: input, shape index: {}]   ;;  %s1084_s2 = inlined_call_operand.vmem [shape: f32[8,128], index: 2, kind: input, shape index: {}]   ;;  %s1085_s3 = inlined_call_operand.vmem [shape: f32[2,256,128], index: 3, kind: input, shape index: {}, may-alias: {3,5}]   ;;  %s1086_s4 = inlined_call_operand.vmem [shape: f32[2,256,128], index: 4, kind: input, shape index: {}]   ;;  %s1087_s5 = inlined_call_operand.vmem [shape: f32[2,256,128], index: 5, kind: output, shape index: {}, may-alias: {3,5}]  }
   0x1   :  { %s926_s20 = smov 0   ;;  %s928_s21 = smov 0  }
   0x2   :  { %s930_s22 = smov 0  }
   0x3 LB: > { %s24_s23 = sadd.s32 1, %s879_s20  ;;  %s27_s24 = sadd.s32 1, %s883_s21  ;;  %s887_s22 = sphi %s930_s22, %s15_s22   ;;  %s883_s21 = sphi %s928_s21, %s1091_s21   ;;  %s879_s20 = sphi %s926_s20, %s1090_s20   ;;  %s875_s19 = sphi %s924_s19, %s1089_s19   ;;  %s871_s18 = sphi %s922_s18, %s1088_s18  }
   0x4   : > { %p25_p0 = scmp.ge.s32.totalorder %s24_s23, 2  ;;  %p705_p1 = scmp.ge.s32.totalorder %s887_s22, 1 }
   0x5   : > { %p233_p2 = scmp.lt.s32.totalorder %s887_s22, 5 }
   0x6   : > { %s1093_s23 = smov (%p25_p0, %s24_s23), 0  ;;  %s1095_s24 = smov (!%p25_p0, %s27_s24), %s883_s21 }
   0x7   : > { %p234_p3 = pnand %p705_p1, %p233_p2  ;;  %p29_p4 = scmp.ge.s32.totalorder %s1095_s24, 2 }
   0x8   : > { %v316_v0 = vld [vmem:[%s1083_s1] sm:$0xff] (!%p234_p3)  ;;  %v317_v1 = vld [vmem:[%s1083_s1 + $0x8] sm:$0xff] (!%p234_p3)  ;;  %v318_v2 = vld [vmem:[%s1083_s1 + $0x10] sm:$0xff] (!%p234_p3)  ;;  %v889_v3 = vmov (!%p234_p3), 0.0|0.0   ;;  %vm890_vm0 = vmmov (!%p234_p3), 0   ;;  %v891_v6 = vmov (!%p234_p3), 0.0   ;;  %v500_v37 = vlaneseq (!%p234_p3) }
   0x9   : > { %s1097_s24 = smov (%p29_p4, %s1095_s24), 0  ;;  %237 = sbr.rel (%p234_p3) target bundleno = 515 (0x203), region = 40 }
   0xa   : > { %778 = vmatprep.subr.bf16.mxu0 (!%p234_p3), %v889_v3  ;;  %v779_v4 = vpack.c.bf16 (!%p234_p3), %v317_v1, %v316_v0  ;;  %v319_v5 = vld [vmem:[%s1083_s1 + $0x18] sm:$0xff] (!%p234_p3)  ;;  %770 = vmatprep.mubr.msk.f32.mxu0 (!%p234_p3), %vm890_vm0, %v891_v6  ;;  %v320_v8 = vld [vmem:[%s1083_s1 + $0x20] sm:$0xff] (!%p234_p3)  ;;  %v321_v9 = vld [vmem:[%s1083_s1 + $0x28] sm:$0xff] (!%p234_p3)  ;;  %p281_p5 = scmp.lt.s32.totalorder (!%p234_p3), %s875_s19, 1  ;;  %vm404_vm1 = vcmask (!%p234_p3), 64512   ;;  %s706_s26 = sshll.u32 (!%p234_p3), %s871_s18, 4 }
   0xb   : > { %773 = vmatprep.subr.mxu1 (!%p234_p3), %v891_v6  ;;  %775 = vmatprep.mubr.msk.f32.mxu1 (!%p234_p3), %vm890_vm0, %v891_v6  ;;  %v782_v7 = vpack.c.bf16 (!%p234_p3), %v319_v5, %v318_v2  ;;  %v785_v10 = vpack.c.bf16 (!%p234_p3), %v321_v9, %v320_v8  ;;  %v322_v11 = vld [vmem:[%s1083_s1 + $0x30] sm:$0xff] (!%p234_p3)  ;;  %v323_v12 = vld [vmem:[%s1083_s1 + $0x38] sm:$0xff] (!%p234_p3)  ;;  %v324_v14 = vld [vmem:[%s1083_s1 + $0x40] sm:$0xff] (!%p234_p3)  ;;  %p287_p6 = scmp.lt.s32.totalorder (!%p234_p3), %s706_s26, 31  ;;  %v501_v38 = vshrl.u32 (!%p234_p3), %v500_v37, 7 }
   0xc   : > { %780 = vmatpush3.bf16.msra.mxu0 (!%p234_p3), %v779_v4  ;;  %v788_v13 = vpack.c.bf16 (!%p234_p3), %v323_v12, %v322_v11  ;;  %v325_v15 = vld [vmem:[%s1083_s1 + $0x48] sm:$0xff] (!%p234_p3)  ;;  %v326_v17 = vld [vmem:[%s1083_s1 + $0x50] sm:$0xff] (!%p234_p3)  ;;  %v327_v18 = vld [vmem:[%s1083_s1 + $0x58] sm:$0xff] (!%p234_p3) }
   0xd   : > { %781 = vmatprep.subr.bf16.mxu0 (!%p234_p3), %v889_v3  ;;  %v791_v16 = vpack.c.bf16 (!%p234_p3), %v325_v15, %v324_v14  ;;  %v794_v19 = vpack.c.bf16 (!%p234_p3), %v327_v18, %v326_v17  ;;  %v328_v20 = vld [vmem:[%s1083_s1 + $0x60] sm:$0xff] (!%p234_p3)  ;;  %v329_v21 = vld [vmem:[%s1083_s1 + $0x68] sm:$0xff] (!%p234_p3)  ;;  %v330_v23 = vld [vmem:[%s1083_s1 + $0x70] sm:$0xff] (!%p234_p3)  ;;  %v502_v39 = vsub.s32 (!%p234_p3), 0, %v501_v38 }
   0xe   : > { %v797_v22 = vpack.c.bf16 (!%p234_p3), %v329_v21, %v328_v20  ;;  %v331_v24 = vld [vmem:[%s1083_s1 + $0x78] sm:$0xff] (!%p234_p3)  ;;  %v403_v28 = vld [vmem:[%s1084_s2] sm:$0xff] (!%p234_p3) }
   0xf   : > { %v800_v25 = vpack.c.bf16 (!%p234_p3), %v331_v24, %v330_v23  ;;  %774 = vmatpush3.msra.mxu1 (!%p234_p3), %v403_v28 }
  0x10   : > { %783 = vmatpush3.bf16.msra.mxu0 %v782_v7  ;;  %s1099_s19 = smov (!%p281_p5, %s875_s19), 1  ;;  %s1101_s26 = smov (!%p287_p6, %s706_s26), 31 }
  0x11   : > { %784 = vmatprep.subr.bf16.mxu0 %v889_v3  ;;  %s283_s16 = scalar_lea.vmem %s1082_s0, %s1099_s19  ;;  %s707_s27 = sshll.u32 %s1099_s19, 5 }
  0x12   : > { %v314_v26 = vld [vmem:[%s283_s16] sm:$0x1]  ;;  %s290_s28 = sadd.s32 %s707_s27, %s1101_s26 }
  0x13   : > { %v315_v27 = vmul.f32 0.00390625, %v314_v26  ;;  %s1017_s29 = sshll.u32 %s290_s28, 3 }
  0x14   : > { %786 = vmatpush3.bf16.msra.mxu0 %v785_v10  ;;  %s292_s7 = scalar_lea.vmem %s1085_s3, %s1017_s29  ;;  %s1027_s8 = scalar_lea.vmem %s1086_s4, %s1017_s29 }
  0x15   : > { %787 = vmatprep.subr.bf16.mxu0 %v889_v3  ;;  %v484_v40 = vld [vmem:[%s292_s7] sm:$0xff]  ;;  %v485_v41 = vld [vmem:[%s292_s7 + $0x8] sm:$0xff]  ;;  %v486_v42 = vld [vmem:[%s292_s7 + $0x10] sm:$0xff]  ;;  %s1049_s11 = scalar_lea.vmem %s1087_s5, %s1017_s29 }
  0x16   : > { %v487_v43 = vld [vmem:[%s292_s7 + $0x18] sm:$0xff]  ;;  %v488_v44 = vld [vmem:[%s292_s7 + $0x20] sm:$0xff]  ;;  %v489_v45 = vld [vmem:[%s292_s7 + $0x28] sm:$0xff] }
  0x17   : > { %v490_v46 = vld [vmem:[%s292_s7 + $0x30] sm:$0xff]  ;;  %v491_v47 = vld [vmem:[%s292_s7 + $0x38] sm:$0xff]  ;;  %v492_v49 = vld [vmem:[%s292_s7 + $0x40] sm:$0xff] }
  0x18   : > { %789 = vmatpush3.bf16.msra.mxu0 %v788_v13  ;;  %v493_v50 = vld [vmem:[%s292_s7 + $0x48] sm:$0xff]  ;;  %v494_v51 = vld [vmem:[%s292_s7 + $0x50] sm:$0xff]  ;;  %v495_v52 = vld [vmem:[%s292_s7 + $0x58] sm:$0xff] }
  0x19   : > { %790 = vmatprep.subr.bf16.mxu0 %v889_v3  ;;  %v496_v53 = vld [vmem:[%s292_s7 + $0x60] sm:$0xff]  ;;  %v497_v54 = vld [vmem:[%s292_s7 + $0x68] sm:$0xff]  ;;  %v498_v56 = vld [vmem:[%s292_s7 + $0x70] sm:$0xff] }
  0x1a   : > { %v499_v57 = vld [vmem:[%s292_s7 + $0x78] sm:$0xff]  ;;  %v520_v58 = vld [vmem:[%s1027_s8] sm:$0xff]  ;;  %v521_v59 = vld [vmem:[%s1027_s8 + $0x8] sm:$0xff] }
  0x1b   : > { %v522_v60 = vld [vmem:[%s1027_s8 + $0x10] sm:$0xff]  ;;  %v523_v61 = vld [vmem:[%s1027_s8 + $0x18] sm:$0xff]  ;;  %v524_v2 = vld [vmem:[%s1027_s8 + $0x20] sm:$0xff] }
  0x1c   : > { %792 = vmatpush3.bf16.msra.mxu0 %v791_v16  ;;  %v526_v4 = vld [vmem:[%s1027_s8 + $0x30] sm:$0xff]  ;;  %v527_v9 = vld [vmem:[%s1027_s8 + $0x38] sm:$0xff]  ;;  %v528_v10 = vld [vmem:[%s1027_s8 + $0x40] sm:$0xff] }
  0x1d   : > { %793 = vmatprep.subr.bf16.mxu0 %v889_v3  ;;  %v529_v11 = vld [vmem:[%s1027_s8 + $0x48] sm:$0xff]  ;;  %v530_v16 = vld [vmem:[%s1027_s8 + $0x50] sm:$0xff]  ;;  %v531_v17 = vld [vmem:[%s1027_s8 + $0x58] sm:$0xff] }
  0x1e   : > { %v532_v18 = vld [vmem:[%s1027_s8 + $0x60] sm:$0xff]  ;;  %v533_v23 = vld [vmem:[%s1027_s8 + $0x68] sm:$0xff]  ;;  %v534_v24 = vld [vmem:[%s1027_s8 + $0x70] sm:$0xff] }
  0x20   : > { %795 = vmatpush3.bf16.msra.mxu0 %v794_v19 }
  0x21   : > { %796 = vmatprep.subr.bf16.mxu0 %v889_v3 }
  0x24   : > { %798 = vmatpush3.bf16.msra.mxu0 %v797_v22 }
  0x25   : > { %799 = vmatprep.subr.bf16.mxu0 %v889_v3  ;;  %v525_v3 = vld [vmem:[%s1027_s8 + $0x28] sm:$0xff] }
  0x28   : > { %801 = vmatpush3.bf16.msra.mxu0 %v800_v25  ;;  %v535_v25 = vld [vmem:[%s1027_s8 + $0x78] sm:$0xff] }
  0x2b   : > { %771 = vmatmul.mubr.f32.vlgmr.msra.gmra.mrb[0].mxu0 %v315_v27 }
  0xfe   : > { %v398_v29 = vpop.f32.mrb[0].mxu0 }
  0xff   : > { %v402_v30 = vmax.f32 %v398_v29, 0.0  ;;  %v772_v31 = vpop.f32.mrb[1].mxu0 }
 0x101   : > { %776 = vmatmul.mubr.msk.f32.vlgmr.msra.gmra.mrb[0].mxu1 %vm404_vm1, %v402_v30 }
 0x1d4   : > { %v474_v32 = vpop.f32.mrb[0].mxu1 }
 0x1d5   : > { %v716_v33 = vmul.f32 -1.442695, %v474_v32  ;;  %v777_v34 = vpop.f32.mrb[1].mxu1 }
 0x1d7   : > { %845 = vpow2.f32 %v716_v33 }
 0x1e1   : > { %v846_v35 = vpop.eup %845 }
 0x1e2   : > { %v481_v36 = vadd.f32 1.0, %v846_v35 }
 0x1e4   : > { %847 = vrcp.f32 %v481_v36 }
 0x1ee   : > { %v848_v48 = vpop.eup %847 }
 0x1ef   : > { %v503_v55 = vrot.slane %v848_v48, %v502_v39 }
 0x1f1   : > { %v504_v62 = vmul.f32 %v503_v55, %v484_v40  ;;  %v505_v63 = vmul.f32 %v503_v55, %v485_v41  ;;  %v506_v0 = vmul.f32 %v503_v55, %v486_v42  ;;  %v507_v1 = vmul.f32 %v503_v55, %v487_v43 }
 0x1f2   : > { %v508_v5 = vmul.f32 %v503_v55, %v488_v44  ;;  %v509_v6 = vmul.f32 %v503_v55, %v489_v45  ;;  %v510_v7 = vmul.f32 %v503_v55, %v490_v46  ;;  %v511_v8 = vmul.f32 %v503_v55, %v491_v47 }
 0x1f3   : > { %v512_v12 = vmul.f32 %v503_v55, %v492_v49  ;;  %v513_v13 = vmul.f32 %v503_v55, %v493_v50  ;;  %v514_v14 = vmul.f32 %v503_v55, %v494_v51  ;;  %v515_v15 = vmul.f32 %v503_v55, %v495_v52 }
 0x1f4   : > { %v516_v19 = vmul.f32 %v503_v55, %v496_v53  ;;  %v517_v20 = vmul.f32 %v503_v55, %v497_v54  ;;  %v518_v21 = vmul.f32 %v503_v55, %v498_v56  ;;  %v519_v22 = vmul.f32 %v503_v55, %v499_v57 }
 0x1f5   : > { %v536_v26 = vadd.f32 %v520_v58, %v504_v62  ;;  %v537_v27 = vadd.f32 %v521_v59, %v505_v63  ;;  %v538_v28 = vadd.f32 %v522_v60, %v506_v0  ;;  %v539_v29 = vadd.f32 %v523_v61, %v507_v1 }
 0x1f6   : > { %v540_v30 = vadd.f32 %v524_v2, %v508_v5  ;;  %v541_v31 = vadd.f32 %v525_v3, %v509_v6  ;;  %v542_v32 = vadd.f32 %v526_v4, %v510_v7  ;;  %v543_v33 = vadd.f32 %v527_v9, %v511_v8 }
 0x1f7   : > { %v544_v34 = vadd.f32 %v528_v10, %v512_v12  ;;  %v545_v35 = vadd.f32 %v529_v11, %v513_v13  ;;  %v546_v36 = vadd.f32 %v530_v16, %v514_v14  ;;  %v547_v37 = vadd.f32 %v531_v17, %v515_v15 }
 0x1f8   : > { %v548_v38 = vadd.f32 %v532_v18, %v516_v19  ;;  %v549_v39 = vadd.f32 %v533_v23, %v517_v20  ;;  %v550_v40 = vadd.f32 %v534_v24, %v518_v21  ;;  %v551_v41 = vadd.f32 %v535_v25, %v519_v22 }
 0x1f9   : > { %v552_v42 = vmax.f32 %v536_v26, 0.0  ;;  %v553_v43 = vmax.f32 %v537_v27, 0.0  ;;  %v554_v44 = vmax.f32 %v538_v28, 0.0  ;;  %v555_v45 = vmax.f32 %v539_v29, 0.0 }
 0x1fa   : > { %v556_v46 = vmax.f32 %v540_v30, 0.0  ;;  %v557_v47 = vmax.f32 %v541_v31, 0.0  ;;  %v558_v48 = vmax.f32 %v542_v32, 0.0  ;;  %v559_v49 = vmax.f32 %v543_v33, 0.0 }
 0x1fb   : > { %v560_v50 = vmax.f32 %v544_v34, 0.0  ;;  %v561_v51 = vmax.f32 %v545_v35, 0.0  ;;  %v562_v52 = vmax.f32 %v546_v36, 0.0  ;;  %v563_v53 = vmax.f32 %v547_v37, 0.0  ;;  %568 = vst [vmem:[%s1049_s11] sm:$0xff] %v552_v42  ;;  %569 = vst [vmem:[%s1049_s11 + $0x8] sm:$0xff] %v553_v43 }
 0x1fc   : > { %570 = vst [vmem:[%s1049_s11 + $0x10] sm:$0xff] %v554_v44  ;;  %571 = vst [vmem:[%s1049_s11 + $0x18] sm:$0xff] %v555_v45  ;;  %v564_v54 = vmax.f32 %v548_v38, 0.0  ;;  %v565_v55 = vmax.f32 %v549_v39, 0.0  ;;  %v566_v56 = vmax.f32 %v550_v40, 0.0  ;;  %v567_v57 = vmax.f32 %v551_v41, 0.0 }
 0x1fd   : > { %572 = vst [vmem:[%s1049_s11 + $0x20] sm:$0xff] %v556_v46  ;;  %573 = vst [vmem:[%s1049_s11 + $0x28] sm:$0xff] %v557_v47 }
 0x1fe   : > { %574 = vst [vmem:[%s1049_s11 + $0x30] sm:$0xff] %v558_v48  ;;  %575 = vst [vmem:[%s1049_s11 + $0x38] sm:$0xff] %v559_v49 }
 0x1ff   : > { %576 = vst [vmem:[%s1049_s11 + $0x40] sm:$0xff] %v560_v50  ;;  %577 = vst [vmem:[%s1049_s11 + $0x48] sm:$0xff] %v561_v51 }
 0x200   : > { %578 = vst [vmem:[%s1049_s11 + $0x50] sm:$0xff] %v562_v52  ;;  %579 = vst [vmem:[%s1049_s11 + $0x58] sm:$0xff] %v563_v53 }
 0x201   : > { %580 = vst [vmem:[%s1049_s11 + $0x60] sm:$0xff] %v564_v54  ;;  %581 = vst [vmem:[%s1049_s11 + $0x68] sm:$0xff] %v565_v55 }
 0x202   : > { %582 = vst [vmem:[%s1049_s11 + $0x70] sm:$0xff] %v566_v56  ;;  %583 = vst [vmem:[%s1049_s11 + $0x78] sm:$0xff] %v567_v57 }
 0x203 PF: > { %s15_s22 = sadd.s32 1, %s887_s22   ;;  %s1088_s18 = smov %s879_s20 }
 0x204   : > { %p12_p7 = scmp.ge.s32.totalorder %s15_s22, 6   ;;  %s1089_s19 = smov %s883_s21 }
 0x205   : > { %s1090_s20 = smov %s1093_s23  ;;  %s1091_s21 = smov %s1097_s24 }
 0x206   :  { %14 = sbr.rel (!%p12_p7) target bundleno = 3 (0x3), region = 76 }

// kernel: se_bottleneck_forward.4
= control target key start
LH: loop header
LB: loop body
LE: loop exit
PB: predicated region body
PF: predicated region fallthrough
CT: control target
= control target key end

     0   :  { %s2135_s30 = smov 0   ;;  %s2137_s10 = smov 0   ;;  %s2646_s0 = inlined_call_operand.vmem [shape: bf16[2,18,18,32], index: 0, kind: input, shape index: {}, may-alias: {0,1}]   ;;  %s2647_s1 = inlined_call_operand.vmem [shape: bf16[2,18,18,32], index: 1, kind: input, shape index: {}, may-alias: {0,1}]   ;;  %s2648_s2 = inlined_call_operand.vmem [shape: bf16[288,32], index: 2, kind: input, shape index: {}]   ;;  %s2649_s3 = inlined_call_operand.vmem [shape: f32[1,32], index: 3, kind: input, shape index: {}]   ;;  %s2650_s4 = inlined_call_operand.vmem [shape: f32[1,32], index: 4, kind: input, shape index: {}]   ;;  %s2651_s5 = inlined_call_operand.vmem [shape: bf16[32,128], index: 5, kind: input, shape index: {}]   ;;  %s2652_s6 = inlined_call_operand.vmem [shape: f32[1,128], index: 6, kind: input, shape index: {}]   ;;  %s2653_s7 = inlined_call_operand.vmem [shape: f32[1,128], index: 7, kind: input, shape index: {}]   ;;  %s2654_s8 = inlined_call_operand.vmem [shape: f32[2,256,128], index: 8, kind: output, shape index: {0}]   ;;  %s2655_s9 = inlined_call_operand.vmem [shape: f32[2,1,128], index: 9, kind: output, shape index: {1}]  }
   0x1   :  { %2656 = sst [smem:[#allocation3_spill]] %s2655_s9  ;;  %s2139_s11 = smov 0  }
   0x2   :  { %s2141_s12 = smov 0   ;;  %s2143_s13 = smov 0  }
   0x3 LB: > { %s29_s14 = sadd.s32 1, %s2071_s11  ;;  %s32_s15 = sadd.s32 1, %s2075_s12  ;;  %s2079_s13 = sphi %s2143_s13, %s20_s13   ;;  %s2075_s12 = sphi %s2141_s12, %s2664_s12   ;;  %s2071_s11 = sphi %s2139_s11, %s2663_s11   ;;  %s2067_s10 = sphi %s2137_s10, %s2662_s10   ;;  %s2063_s30 = sphi %s2135_s30, %s2661_s30  }
   0x4   : > { %p30_p0 = scmp.ge.s32.totalorder %s29_s14, 2  ;;  %p1749_p1 = scmp.ge.s32.totalorder %s2079_s13, 1 }
   0x5   : > { %p348_p2 = scmp.lt.s32.totalorder %s2079_s13, 5 }
   0x6   : > { %s2666_s14 = smov (%p30_p0, %s29_s14), 0  ;;  %s2668_s15 = smov (!%p30_p0, %s32_s15), %s2075_s12 }
   0x7   : > { %p349_p3 = pnand %p1749_p1, %p348_p2  ;;  %p34_p4 = scmp.ge.s32.totalorder %s2668_s15, 2 }
   0x8   : > { %s2168_s16 = sshll.u32 (!%p349_p3), %s2063_s30, 3  ;;  %p419_p5 = scmp.lt.s32.totalorder (!%p349_p3), %s2067_s10, 1  ;;  %v2021_v0 = vld [vmem:[%s2648_s2 + $0x40] sm:$0xff] (!%p349_p3)   ;;  %v2023_v2 = vld [vmem:[%s2648_s2 + $0x48] sm:$0xff] (!%p349_p3)   ;;  %vm670_vm0 = vcmask (!%p349_p3), 1046528   ;;  %v2025_v4 = vld [vmem:[%s2648_s2 + $0x50] sm:$0xff] (!%p349_p3)  }
   0x9   : > { %s2670_s15 = smov (%p34_p4, %s2668_s15), 0  ;;  %352 = sbr.rel (%p349_p3) target bundleno = 726 (0x2d6), region = 52 }
   0xa   : > { %2657 = sst [smem:[#allocation2_spill]] %s2670_s15  ;;  %p421_p6 = scmp.lt.s32.totalorder (!%p349_p3), %s2168_s16, 17  ;;  %1830 = vmatprep.subr.bf16.mxu0 (!%p349_p3), %v2021_v0  ;;  %v2022_v1 = vld [vmem:[%s2648_s2] sm:$0xff] (!%p349_p3)   ;;  %v2024_v3 = vld [vmem:[%s2648_s2 + $0x8] sm:$0xff] (!%p349_p3)   ;;  %v2026_v5 = vld [vmem:[%s2648_s2 + $0x10] sm:$0xff] (!%p349_p3)   ;;  %vm821_vm2 = vcmask (!%p349_p3), 261120  }
   0xb   : > { %s2658_s9 = sld [smem:[#allocation3_spill]] (!%p349_p3)  ;;  %1831 = vmatpush3.bf16.msra.mxu0 (!%p349_p3), %v2022_v1  ;;  %s1829_s22 = sadd.s32 (!%p349_p3), 8, %s2168_s16  ;;  %v2027_v6 = vld [vmem:[%s2648_s2 + $0x58] sm:$0xff] (!%p349_p3)   ;;  %vm557_vm1 = vsmask.f32 (!%p349_p3), 7424  ;;  %v2029_v48 = vld [vmem:[%s2648_s2 + $0x60] sm:$0xff] (!%p349_p3)  }
   0xc   : > { %1832 = vmatprep.subr.bf16.mxu0 (!%p349_p3), %v2023_v2  ;;  %v2028_v8 = vld [vmem:[%s2648_s2 + $0x18] sm:$0xff] (!%p349_p3)   ;;  %p2226_p7 = scmp.lt.s32.totalorder (!%p349_p3), %s1829_s22, 17  ;;  %s2083_s23 = smov (!%p349_p3), 32   ;;  %v2030_v63 = vld [vmem:[%s2648_s2 + $0x20] sm:$0xff] (!%p349_p3)   ;;  %vm838_vm3 = vcmask (!%p349_p3), 523264   ;;  %vm855_vm4 = vcmask (!%p349_p3), 785408  }
   0xd   : > { %s1755_s18 = sshll.u32 (!%p349_p3), %s2063_s30, 4  ;;  %p1818_p9 = scmp.ne.s32.totalorder (!%p349_p3), %s2063_s30, 0 }
   0xe   : > { %p452_p8 = scmp.lt.s32.totalorder (!%p349_p3), %s1755_s18, 31 }
   0xf   : > { %1833 = vmatpush3.bf16.msra.mxu0 (!%p349_p3), %v2024_v3 }
  0x10   : > { %s2672_s10 = smov (!%p419_p5, %s2067_s10), 1  ;;  %1834 = vmatprep.subr.bf16.mxu0 %v2025_v4  ;;  %s2674_s22 = smov (!%p2226_p7, %s1829_s22), 17  ;;  %v2031_v4 = vld [vmem:[%s2648_s2 + $0x68] sm:$0xff]  }
  0x11   : > { %s422_s21 = scalar_select %p421_p6, %s2168_s16, 17 }
  0x12   : > { %s1955_s24 = smul.u32 54, %s2672_s10  ;;  %s2188_s27 = scalar_lea.vmem %s2658_s9, %s2672_s10 }
  0x13   : > { %s1954_s17 = smul.u32 3, %s422_s21  ;;  %s2081_s9 = smov 64   ;;  %1835 = vmatpush3.bf16.msra.mxu0 %v2026_v5 }
  0x14   : > { %1836 = vmatprep.subr.bf16.mxu0 %v2027_v6  ;;  %s1956_s16 = smul.u32 3, %s2674_s22  ;;  %v2032_v6 = vld [vmem:[%s2648_s2 + $0x28] sm:$0xff]   ;;  %s2676_s18 = smov (!%p452_p8, %s1755_s18), 31 }
  0x15   : > { %s425_s20 = sadd.s32 %s1955_s24, %s1954_s17  ;;  %s1756_s19 = sshll.u32 %s2672_s10, 5 }
  0x16   : > { %s1751_s26 = sshll.u32 %s425_s20, 2  ;;  %s2082_s20 = smov 96  }
  0x17   : > { %s2208_s15 = scalar_lea.vmem %s2646_s0, %s1751_s26  ;;  %1837 = vmatpush3.bf16.msra.mxu0 %v2028_v8  ;;  %s443_s25 = sadd.s32 %s1956_s16, %s1955_s24 }
  0x18   : > { %v2211_v7 = vld [vmem:[%s2208_s15 + $0x24] sm:$0xff]   ;;  %v2217_v9 = vld [vmem:[%s2208_s15 + $0x18] sm:$0xff]   ;;  %v2222_v10 = vld [vmem:[%s2208_s15 + $0xc] sm:$0xff]   ;;  %s1754_s22 = sshll.u32 %s443_s25, 2  ;;  %1838 = vmatprep.subr.bf16.mxu0 %v2029_v48  ;;  %s455_s16 = sadd.s32 %s1756_s19, %s2676_s18 }
  0x19   : > { %773 = vrot.lane.b32.xlu0 %v2211_v7, %s2081_s9  ;;  %771 = vrot.lane.b32.xlu1 %v2217_v9, %s2081_s9  ;;  %v2004_v11 = vld [vmem:[%s2208_s15 + $0x14] ss:$0 sps:$4 sm:$0x11]   ;;  %v677_v12 = vrot.slane %v2217_v9, 1  ;;  %v674_v13 = vrot.slane %v2222_v10, 1  ;;  %v2237_v16 = vld [vmem:[%s2208_s15] sm:$0xff]   ;;  %s2293_s29 = scalar_lea.vmem %s2647_s1, %s1754_s22 }
  0x1a   : > { %v2005_v14 = vld [vmem:[%s2208_s15 + $0x20] ss:$0 sps:$4 sm:$0x11]   ;;  %v675_v15 = vrot.slane %v2004_v11, 1  ;;  %v559_v20 = vshrl.u32 %v2237_v16, 16  ;;  %v561_v21 = vshll.u32 %v2237_v16, 16 }
  0x1b   : > { %v678_v17 = vrot.slane %v2005_v14, 1  ;;  %v2007_v18 = vld [vmem:[%s2208_s15 + $0x8] ss:$0 sps:$4 sm:$0x11]   ;;  %v671_v23 = vrot.slane %v2237_v16, 1  ;;  %v583_v28 = vshrl.u32 %v2217_v9, 16  ;;  %1839 = vmatpush3.bf16.msra.mxu0 %v2030_v63 }
  0x1c   : > { %v676_v19 = vsel %vm670_vm0, %v674_v13, %v675_v15  ;;  %v672_v24 = vrot.slane %v2007_v18, 1  ;;  %v566_v25 = vshll.u32 %v2007_v18, 16  ;;  %v2008_v26 = vld [vmem:[%s2208_s15 + $0x2c] ss:$0 sps:$4 sm:$0x11]   ;;  %v563_v27 = vrot.slane %v561_v21, 1  ;;  %1840 = vmatprep.subr.bf16.mxu0 %v2031_v4 }
  0x1d   : > { %716 = vrot.lane.b32.xlu1 %v2222_v10, %s2082_s20  ;;  %750 = vrot.lane.b32.xlu0 %v676_v19, %s2083_s23  ;;  %v2247_v22 = vsel %vm670_vm0, %v677_v12, %v678_v17  ;;  %v585_v29 = vshll.u32 %v2217_v9, 16  ;;  %v590_v30 = vshll.u32 %v2005_v14, 16  ;;  %v573_v32 = vshll.u32 %v2222_v10, 16  ;;  %v2280_v52 = vld [vmem:[%s2208_s15 + $0x30] sm:$0xff]   ;;  %v2312_v2 = vld [vmem:[%s2208_s15 + $0x3c] sm:$0xff]   ;;  %s1757_s28 = sshll.u32 %s455_s16, 3 }
  0x1e   : > { %1918 = vmatprep.mubr.msk.bf16.mxu1 %vm821_vm2, %v2247_v22  ;;  %v568_v31 = vrot.slane %v566_v25, 1  ;;  %v595_v33 = vshrl.u32 %v2211_v7, 16  ;;  %v564_v34 = vor.u32 %v563_v27, %v559_v20  ;;  %v571_v36 = vshrl.u32 %v2222_v10, 16  ;;  %v2010_v55 = vld [vmem:[%s2208_s15 + $0x38] ss:$0 sps:$4 sm:$0x11]  }
  0x1f   : > { %v587_v35 = vrot.slane %v585_v29, 1  ;;  %v597_v37 = vshll.u32 %v2211_v7, 16  ;;  %v673_v38 = vsel %vm670_vm0, %v671_v23, %v672_v24  ;;  %v592_v39 = vrot.slane %v590_v30, 1  ;;  %v2012_v3 = vld [vmem:[%s2208_s15 + $0x44] ss:$0 sps:$4 sm:$0x11]   ;;  %1841 = vmatpush3.bf16.msra.mxu0 %v2032_v6 }
  0x20   : > { %v575_v40 = vrot.slane %v573_v32, 1  ;;  %v578_v41 = vshll.u32 %v2004_v11, 16  ;;  %v569_v42 = vsel %vm557_vm1, %v564_v34, %v568_v31  ;;  %v602_v45 = vshll.u32 %v2008_v26, 16  ;;  %v2033_v11 = vld [vmem:[%s2648_s2 + $0x70] sm:$0xff]   ;;  %v2035_v15 = vld [vmem:[%s2648_s2 + $0x80] sm:$0xff]   ;;  %v2036_v18 = vld [vmem:[%s2648_s2 + $0x78] sm:$0xff]  }
  0x21   : > { %718 = vrot.lane.b32.xlu1 %v2217_v9, %s2082_s20  ;;  %752 = vrot.lane.b32.xlu0 %v2247_v22, %s2083_s23  ;;  %v588_v43 = vor.u32 %v587_v35, %v583_v28  ;;  %v599_v44 = vrot.slane %v597_v37, 1  ;;  %v680_v54 = vrot.slane %v2211_v7, 1  ;;  %v681_v57 = vrot.slane %v2008_v26, 1  ;;  %v2034_v14 = vld [vmem:[%s2648_s2 + $0x30] sm:$0xff]   ;;  %v2037_v20 = vld [vmem:[%s2648_s2 + $0x38] sm:$0xff]  }
  0x22   : > { %v576_v46 = vor.u32 %v575_v40, %v571_v36  ;;  %v580_v47 = vrot.slane %v578_v41, 1  ;;  %v604_v51 = vrot.slane %v602_v45, 1  ;;  %v609_v58 = vshll.u32 %v2280_v52, 16  ;;  %1842 = vmatprep.subr.bf16.mxu0 %v2033_v11  ;;  %1914 = vmatprep.subr.bf16.mxu1 %v2035_v15  ;;  %v2038_v23 = vld [vmem:[%s2648_s2 + $0x88] sm:$0xff]   ;;  %v2384_v41 = vld [vmem:[%s2208_s15 + $0x54] sm:$0xff]  }
  0x23   : > { %v2277_v49 = vsel %vm557_vm1, %v588_v43, %v592_v39  ;;  %v600_v50 = vor.u32 %v599_v44, %v595_v33  ;;  %v682_v59 = vsel %vm670_vm0, %v680_v54, %v681_v57  ;;  %v607_v60 = vshrl.u32 %v2280_v52, 16  ;;  %1843 = vmatpush3.bf16.msra.mxu0 %v2034_v14  ;;  %1915 = vmatpush3.bf16.msra.mxu1 %v2035_v15  ;;  %v2358_v26 = vld [vmem:[%s2208_s15 + $0x48] sm:$0xff]   ;;  %v2014_v30 = vld [vmem:[%s2208_s15 + $0x50] ss:$0 sps:$4 sm:$0x11]   ;;  %v2017_v43 = vld [vmem:[%s2293_s29] sm:$0xff]  }
  0x24   : > { %v2286_v53 = vsel %vm557_vm1, %v576_v46, %v580_v47  ;;  %v611_v61 = vrot.slane %v609_v58, 1  ;;  %v614_v62 = vshll.u32 %v2010_v55, 16  ;;  %v683_v5 = vrot.slane %v2280_v52, 1  ;;  %1844 = vmatprep.subr.bf16.mxu0 %v2036_v18  ;;  %1916 = vmatprep.subr.bf16.mxu1 %v2038_v23  ;;  %v2018_v44 = vld [vmem:[%s2293_s29 + $0x8] ss:$0 sps:$4 sm:$0x11]  }
  0x25   : > { %695 = vrot.lane.b32.xlu1 %v673_v38, %s2081_s9  ;;  %654 = vrot.lane.b32.xlu0 %v569_v42, %s2083_s23  ;;  %v2296_v56 = vsel %vm557_vm1, %v600_v50, %v604_v51  ;;  %v684_v8 = vrot.slane %v2010_v55, 1  ;;  %v621_v13 = vshll.u32 %v2312_v2, 16  ;;  %v619_v17 = vshrl.u32 %v2312_v2, 16  ;;  %v2016_v42 = vld [vmem:[%s2208_s15 + $0x5c] ss:$0 sps:$4 sm:$0x11]  }
  0x26   : > { %v612_v0 = vor.u32 %v611_v61, %v607_v60  ;;  %v616_v1 = vrot.slane %v614_v62, 1  ;;  %v686_v28 = vrot.slane %v2312_v2, 1  ;;  %v687_v29 = vrot.slane %v2012_v3, 1 }
  0x27   : > { %v685_v21 = vsel %vm670_vm0, %v683_v5, %v684_v8  ;;  %1845 = vmatpush3.bf16.msra.mxu0 %v2037_v20  ;;  %1917 = vmatpush3.bf16.msra.mxu1 %v2038_v23  ;;  %v633_v31 = vshll.u32 %v2358_v26, 16  ;;  %v689_v32 = vrot.slane %v2358_v26, 1  ;;  %v690_v33 = vrot.slane %v2014_v30, 1 }
  0x28   : > { %v2330_v12 = vsel %vm557_vm1, %v612_v0, %v616_v1  ;;  %v688_v34 = vsel %vm670_vm0, %v686_v28, %v687_v29  ;;  %v631_v35 = vshrl.u32 %v2358_v26, 16  ;;  %v638_v37 = vshll.u32 %v2014_v30, 16  ;;  %v2019_v0 = vld [vmem:[%s2293_s29 + $0xc] sm:$0xff]   ;;  %v2020_v1 = vld [vmem:[%s2293_s29 + $0x14] ss:$0 sps:$4 sm:$0x11]  }
  0x29   : > { %697 = vrot.lane.b32.xlu1 %v676_v19, %s2081_s9  ;;  %802 = vrot.lane.b32.xlu0 %v2277_v49, %s2082_s20  ;;  %v626_v19 = vshll.u32 %v2012_v3, 16  ;;  %v635_v36 = vrot.slane %v633_v31, 1  ;;  %v691_v38 = vsel %vm670_vm0, %v689_v32, %v690_v33  ;;  %v692_v45 = vrot.slane %v2384_v41, 1 }
  0x2a   : > { %1919 = vmatmul.mubr.msk.bf16.vlgmr.msra.gmra.mrb[0].mxu1 %vm821_vm2, %v682_v59  ;;  %v640_v40 = vrot.slane %v638_v37, 1  ;;  %v693_v46 = vrot.slane %v2016_v42, 1  ;;  %v747_v47 = vrot.slane %v2017_v43, 1  ;;  %v748_v48 = vrot.slane %v2018_v44, 1 }
  0x2b   : > { %v628_v25 = vrot.slane %v626_v19, 1  ;;  %1922 = vmatprep.mubr.msk.bf16.mxu1 %vm821_vm2, %v685_v21  ;;  %v636_v39 = vor.u32 %v635_v36, %v631_v35  ;;  %v645_v51 = vshll.u32 %v2384_v41, 16  ;;  %v643_v57 = vshrl.u32 %v2384_v41, 16 }
  0x2c   : > { %v694_v54 = vsel %vm670_vm0, %v692_v45, %v693_v46  ;;  %v749_v55 = vsel %vm670_vm0, %v747_v47, %v748_v48  ;;  %v738_v63 = vshll.u32 %v2017_v43, 16  ;;  %v818_v3 = vrot.slane %v2019_v0, 1 }
  0x2d   : > { %656 = vrot.lane.b32.xlu1 %v2286_v53, %s2083_s23  ;;  %804 = vrot.lane.b32.xlu0 %v2296_v56, %s2082_s20  ;;  %v2395_v50 = vsel %vm557_vm1, %v636_v39, %v640_v40  ;;  %v647_v58 = vrot.slane %v645_v51, 1  ;;  %v819_v4 = vrot.slane %v2020_v1, 1  ;;  %v736_v5 = vshrl.u32 %v2017_v43, 16 }
  0x2e   : > { %v740_v6 = vrot.slane %v738_v63, 1  ;;  %v743_v8 = vshll.u32 %v2018_v44, 16  ;;  %v791_v18 = vshrl.u32 %v2019_v0, 16  ;;  %v798_v20 = vshll.u32 %v2020_v1, 16 }
  0x2f   : > { %v648_v60 = vor.u32 %v647_v58, %v643_v57  ;;  %v820_v11 = vsel %vm670_vm0, %v818_v3, %v819_v4 }
  0x30   : > { %v745_v14 = vrot.slane %v743_v8, 1 }
  0x31   : > { %658 = vrot.lane.b32.xlu1 %v2277_v49, %s2083_s23  ;;  %754 = vrot.lane.b32.xlu0 %v682_v59, %s2083_s23 }
  0x32   : > { %1923 = vmatmul.mubr.msk.bf16.gmra.mrb[4].mxu1 %vm821_vm2, %v688_v34 }
  0x33   : > { %1926 = vmatprep.mubr.msk.bf16.mxu1 %vm821_vm2, %v691_v38 }
  0x35   : > { %699 = vrot.lane.b32.xlu1 %v2247_v22, %s2081_s9  ;;  %775 = vrot.lane.b32.xlu0 %v2280_v52, %s2081_s9  ;;  %v623_v22 = vrot.slane %v621_v13, 1  ;;  %v741_v13 = vor.u32 %v740_v6, %v736_v5 }
  0x37   : > { %v624_v24 = vor.u32 %v623_v22, %v619_v17  ;;  %v2430_v15 = vsel %vm557_vm1, %v741_v13, %v745_v14  ;;  %v793_v17 = vshll.u32 %v2019_v0, 16  ;;  %v800_v22 = vrot.slane %v798_v20, 1 }
  0x39   : > { %720 = vrot.lane.b32.xlu1 %v2211_v7, %s2082_s20  ;;  %806 = vrot.lane.b32.xlu0 %v2330_v12, %s2082_s20  ;;  %v2365_v27 = vsel %vm557_vm1, %v624_v24, %v628_v25  ;;  %v795_v19 = vrot.slane %v793_v17, 1 }
  0x3a   : > { %1927 = vmatmul.mubr.msk.bf16.gmra.mrb[8].mxu1 %vm821_vm2, %v694_v54 }
  0x3b   : > { %1930 = vmatprep.mubr.msk.bf16.mxu1 %vm821_vm2, %v749_v55 }
  0x3d   : > { %660 = vrot.lane.b32.xlu1 %v2296_v56, %s2083_s23  ;;  %756 = vrot.lane.b32.xlu0 %v685_v21, %s2083_s23 }
  0x41   : > { %701 = vrot.lane.b32.xlu1 %v682_v59, %s2081_s9  ;;  %777 = vrot.lane.b32.xlu0 %v2312_v2, %s2081_s9  ;;  %v650_v59 = vshll.u32 %v2016_v42, 16 }
  0x42   : > { %1931 = vmatmul.mubr.msk.bf16.gmra.mrb[12].mxu1 %vm821_vm2, %v820_v11 }
  0x43   : > { %v652_v61 = vrot.slane %v650_v59, 1 }
  0x45   : > { %722 = vrot.lane.b32.xlu1 %v2280_v52, %s2082_s20  ;;  %808 = vrot.lane.b32.xlu0 %v2365_v27, %s2082_s20  ;;  %v2414_v62 = vsel %vm557_vm1, %v648_v60, %v652_v61 }
  0x49   : > { %662 = vrot.lane.b32.xlu1 %v2330_v12, %s2083_s23  ;;  %758 = vrot.lane.b32.xlu0 %v688_v34, %s2083_s23 }
  0x4d   : > { %703 = vrot.lane.b32.xlu1 %v685_v21, %s2081_s9  ;;  %779 = vrot.lane.b32.xlu0 %v2358_v26, %s2081_s9  ;;  %v796_v21 = vor.u32 %v795_v19, %v791_v18 }
  0x4f   : > { %v801_v23 = vsel %vm557_vm1, %v796_v21, %v800_v22 }
  0x51   : > { %724 = vrot.lane.b32.xlu1 %v2312_v2, %s2082_s20  ;;  %810 = vrot.lane.b32.xlu0 %v2395_v50, %s2082_s20 }
  0x55   : > { %664 = vrot.lane.b32.xlu1 %v2365_v27, %s2083_s23  ;;  %760 = vrot.lane.b32.xlu0 %v691_v38, %s2083_s23 }
  0x59   : > { %705 = vrot.lane.b32.xlu1 %v688_v34, %s2081_s9  ;;  %781 = vrot.lane.b32.xlu0 %v2384_v41, %s2081_s9 }
  0x5d   : > { %726 = vrot.lane.b32.xlu1 %v2358_v26, %s2082_s20  ;;  %812 = vrot.lane.b32.xlu0 %v2414_v62, %s2082_s20 }
  0x61   : > { %666 = vrot.lane.b32.xlu1 %v2395_v50, %s2083_s23  ;;  %762 = vrot.lane.b32.xlu0 %v694_v54, %s2083_s23 }
  0x65   : > { %707 = vrot.lane.b32.xlu1 %v691_v38, %s2081_s9  ;;  %783 = vrot.lane.b32.xlu0 %v2017_v43, %s2081_s9 }
  0x69   : > { %728 = vrot.lane.b32.xlu1 %v2384_v41, %s2082_s20  ;;  %814 = vrot.lane.b32.xlu0 %v2430_v15, %s2082_s20 }
  0x6d   : > { %668 = vrot.lane.b32.xlu1 %v2414_v62, %s2083_s23  ;;  %764 = vrot.lane.b32.xlu0 %v749_v55, %s2083_s23  ;;  %s2605_s23 = scalar_lea.vmem %s2654_s8, %s1757_s28 }
  0x71   : > { %709 = vrot.lane.b32.xlu1 %v694_v54, %s2081_s9  ;;  %785 = vrot.lane.b32.xlu0 %v2019_v0, %s2081_s9 }
  0x75   : > { %730 = vrot.lane.b32.xlu1 %v2017_v43, %s2082_s20  ;;  %816 = vrot.lane.b32.xlu0 %v801_v23, %s2082_s20 }
  0x8b   : > { %v774_v24 = vpop.permute.xlu0 %773  ;;  %v772_v25 = vpop.permute.xlu1 %771 }
  0x8f   : > { %v717_v28 = vpop.permute.xlu1 %716  ;;  %v751_v29 = vpop.permute.xlu0 %750 }
  0x90   : > { %v882_v34 = vsel %vm821_vm2, %v2286_v53, %v751_v29 }
  0x91   : > { %v905_v39 = vsel %vm838_vm3, %v882_v34, %v772_v25 }
  0x93   : > { %v719_v30 = vpop.permute.xlu1 %718  ;;  %v753_v31 = vpop.permute.xlu0 %752 }
  0x94   : > { %v885_v40 = vsel %vm821_vm2, %v2277_v49, %v753_v31 }
  0x95   : > { %v907_v45 = vsel %vm838_vm3, %v885_v40, %v774_v24 }
  0x97   : > { %v696_v32 = vpop.permute.xlu1 %695  ;;  %v655_v33 = vpop.permute.xlu0 %654 }
  0x98   : > { %v823_v35 = vsel %vm821_vm2, %v2237_v16, %v655_v33 }
  0x99   : > { %v840_v37 = vsel %vm838_vm3, %v823_v35, %v696_v32 }
  0x9a   : > { %v857_v43 = vsel %vm855_vm4, %v840_v37, %v717_v28 }
  0x9b   : > { %v698_v36 = vpop.permute.xlu1 %697  ;;  %v803_v38 = vpop.permute.xlu0 %802 }
  0x9c   : > { %v921_v42 = vsel %vm855_vm4, %v905_v39, %v803_v38 }
  0x9d   : > { %1144 = vmatprep.mubr.bf16.mxu0 %v921_v42 }
  0x9e   : > { %1145 = vmatmul.mubr.bf16.vlgmr.msra.gmra.mrb[0].mxu0 %v857_v43 }
  0x9f   : > { %v657_v53 = vpop.permute.xlu1 %656  ;;  %v805_v44 = vpop.permute.xlu0 %804 }
  0xa0   : > { %v825_v16 = vsel %vm821_vm2, %v2222_v10, %v657_v53  ;;  %v924_v46 = vsel %vm855_vm4, %v907_v45, %v805_v44 }
  0xa1   : > { %1152 = vmatprep.mubr.bf16.mxu0 %v924_v46  ;;  %v842_v48 = vsel %vm838_vm3, %v825_v16, %v698_v36 }
  0xa2   : > { %v860_v51 = vsel %vm855_vm4, %v842_v48, %v719_v30 }
  0xa3   : > { %v659_v47 = vpop.permute.xlu1 %658  ;;  %v755_v49 = vpop.permute.xlu0 %754 }
  0xa4   : > { %v827_v57 = vsel %vm821_vm2, %v2217_v9, %v659_v47  ;;  %v888_v10 = vsel %vm821_vm2, %v2296_v56, %v755_v49 }
  0xa6   : > { %1153 = vmatmul.mubr.bf16.gmra.mrb[4].mxu0 %v860_v51 }
  0xa7   : > { %v700_v54 = vpop.permute.xlu1 %699  ;;  %v776_v55 = vpop.permute.xlu0 %775 }
  0xa8   : > { %v844_v58 = vsel %vm838_vm3, %v827_v57, %v700_v54  ;;  %v909_v60 = vsel %vm838_vm3, %v888_v10, %v776_v55 }
  0xab   : > { %v721_v59 = vpop.permute.xlu1 %720  ;;  %v807_v61 = vpop.permute.xlu0 %806 }
  0xac   : > { %v863_v63 = vsel %vm855_vm4, %v844_v58, %v721_v59  ;;  %v927_v0 = vsel %vm855_vm4, %v909_v60, %v807_v61 }
  0xad   : > { %1160 = vmatprep.mubr.bf16.mxu0 %v927_v0 }
  0xae   : > { %1161 = vmatmul.mubr.bf16.gmra.mrb[8].mxu0 %v863_v63  ;;  %v2039_v63 = vld [vmem:[%s2651_s5] sm:$0xff]  }
  0xaf   : > { %v661_v1 = vpop.permute.xlu1 %660  ;;  %v757_v3 = vpop.permute.xlu0 %756  ;;  %1934 = vmatprep.subr.bf16.mxu1 %v2039_v63 }
  0xb0   : > { %v829_v9 = vsel %vm821_vm2, %v2211_v7, %v661_v1  ;;  %v891_v56 = vsel %vm821_vm2, %v2330_v12, %v757_v3  ;;  %1935 = vmatpush3.bf16.msra.mxu1 %v2039_v63 }
  0xb3   : > { %v702_v4 = vpop.permute.xlu1 %701  ;;  %v778_v5 = vpop.permute.xlu0 %777 }
  0xb4   : > { %v846_v6 = vsel %vm838_vm3, %v829_v9, %v702_v4  ;;  %v911_v11 = vsel %vm838_vm3, %v891_v56, %v778_v5 }
  0xb7   : > { %v723_v8 = vpop.permute.xlu1 %722  ;;  %v809_v13 = vpop.permute.xlu0 %808 }
  0xb8   : > { %v866_v14 = vsel %vm855_vm4, %v846_v6, %v723_v8  ;;  %v930_v17 = vsel %vm855_vm4, %v911_v11, %v809_v13 }
  0xb9   : > { %1168 = vmatprep.mubr.bf16.mxu0 %v930_v17 }
  0xba   : > { %1169 = vmatmul.mubr.bf16.gmra.mrb[12].mxu0 %v866_v14 }
  0xbb   : > { %v663_v18 = vpop.permute.xlu1 %662  ;;  %v759_v19 = vpop.permute.xlu0 %758 }
  0xbc   : > { %v831_v7 = vsel %vm821_vm2, %v2280_v52, %v663_v18  ;;  %v894_v12 = vsel %vm821_vm2, %v2365_v27, %v759_v19 }
  0xbf   : > { %v704_v20 = vpop.permute.xlu1 %703  ;;  %v780_v21 = vpop.permute.xlu0 %779 }
  0xc0   : > { %v848_v22 = vsel %vm838_vm3, %v831_v7, %v704_v20  ;;  %v913_v24 = vsel %vm838_vm3, %v894_v12, %v780_v21 }
  0xc3   : > { %v725_v23 = vpop.permute.xlu1 %724  ;;  %v811_v25 = vpop.permute.xlu0 %810 }
  0xc4   : > { %v869_v28 = vsel %vm855_vm4, %v848_v22, %v725_v23  ;;  %v933_v29 = vsel %vm855_vm4, %v913_v24, %v811_v25  ;;  %v2537_v23 = vld [vmem:[%s2649_s3] ss:$0 sm:$0xff] }
  0xc5   : > { %1176 = vmatprep.mubr.bf16.mxu0 %v933_v29 }
  0xc6   : > { %1177 = vmatmul.mubr.bf16.gmra.mrb[16].mxu0 %v869_v28  ;;  %v2542_v28 = vld [vmem:[%s2650_s4] ss:$0 sm:$0xff] }
  0xc7   : > { %v665_v30 = vpop.permute.xlu1 %664  ;;  %v761_v31 = vpop.permute.xlu0 %760 }
  0xc8   : > { %v833_v52 = vsel %vm821_vm2, %v2312_v2, %v665_v30  ;;  %v897_v27 = vsel %vm821_vm2, %v2395_v50, %v761_v31 }
  0xcb   : > { %v706_v32 = vpop.permute.xlu1 %705  ;;  %v782_v33 = vpop.permute.xlu0 %781 }
  0xcc   : > { %v850_v34 = vsel %vm838_vm3, %v833_v52, %v706_v32  ;;  %v915_v36 = vsel %vm838_vm3, %v897_v27, %v782_v33 }
  0xcf   : > { %v727_v35 = vpop.permute.xlu1 %726  ;;  %v813_v37 = vpop.permute.xlu0 %812 }
  0xd0   : > { %v872_v38 = vsel %vm855_vm4, %v850_v34, %v727_v35  ;;  %v936_v39 = vsel %vm855_vm4, %v915_v36, %v813_v37 }
  0xd1   : > { %1184 = vmatprep.mubr.bf16.mxu0 %v936_v39 }
  0xd2   : > { %1185 = vmatmul.mubr.bf16.gmra.mrb[20].mxu0 %v872_v38 }
  0xd3   : > { %v667_v40 = vpop.permute.xlu1 %666  ;;  %v763_v42 = vpop.permute.xlu0 %762 }
  0xd4   : > { %v835_v2 = vsel %vm821_vm2, %v2358_v26, %v667_v40  ;;  %v900_v50 = vsel %vm821_vm2, %v2414_v62, %v763_v42 }
  0xd7   : > { %v708_v43 = vpop.permute.xlu1 %707  ;;  %v784_v53 = vpop.permute.xlu0 %783 }
  0xd8   : > { %v852_v16 = vsel %vm838_vm3, %v835_v2, %v708_v43  ;;  %v917_v45 = vsel %vm838_vm3, %v900_v50, %v784_v53 }
  0xdb   : > { %v729_v44 = vpop.permute.xlu1 %728  ;;  %v815_v46 = vpop.permute.xlu0 %814 }
  0xdc   : > { %v875_v47 = vsel %vm855_vm4, %v852_v16, %v729_v44  ;;  %v939_v48 = vsel %vm855_vm4, %v917_v45, %v815_v46 }
  0xdd   : > { %1192 = vmatprep.mubr.bf16.mxu0 %v939_v48 }
  0xde   : > { %1193 = vmatmul.mubr.bf16.gmra.mrb[24].mxu0 %v875_v47 }
  0xdf   : > { %v669_v49 = vpop.permute.xlu1 %668  ;;  %v765_v51 = vpop.permute.xlu0 %764 }
  0xe0   : > { %v837_v26 = vsel %vm821_vm2, %v2384_v41, %v669_v49  ;;  %v903_v62 = vsel %vm821_vm2, %v2430_v15, %v765_v51  ;;  %v2040_v41 = vld [vmem:[%s2651_s5 + $0x8] sm:$0xff]  }
  0xe1   : > { %1936 = vmatprep.subr.bf16.mxu1 %v2040_v41 }
  0xe2   : > { %1937 = vmatpush3.bf16.msra.mxu1 %v2040_v41 }
  0xe3   : > { %v710_v54 = vpop.permute.xlu1 %709  ;;  %v786_v55 = vpop.permute.xlu0 %785 }
  0xe4   : > { %v854_v57 = vsel %vm838_vm3, %v837_v26, %v710_v54  ;;  %v919_v58 = vsel %vm838_vm3, %v903_v62, %v786_v55 }
  0xe7   : > { %v731_v10 = vpop.permute.xlu1 %730  ;;  %v817_v59 = vpop.permute.xlu0 %816 }
  0xe8   : > { %v878_v60 = vsel %vm855_vm4, %v854_v57, %v731_v10  ;;  %v942_v61 = vsel %vm855_vm4, %v919_v58, %v817_v59 }
  0xe9   : > { %1200 = vmatprep.mubr.bf16.mxu0 %v942_v61 }
  0xea   : > { %1201 = vmatmul.mubr.bf16.gmra.mrb[28].mxu0 %v878_v60 }
  0xfd   : > { %v1920_v15 = vpop.f32.mrb[0].mxu1 }
  0xfe   : > { %v1243_v0 = vpop.f32.mrb[1].mxu1 }
  0xff   : > { %v1921_v1 = vpop.f32.mrb[2].mxu1 }
 0x100   : > { %v1246_v3 = vpop.f32.mrb[3].mxu1 }
 0x105   : > { %v2514_v4 = vpop.f32.mrb[4].mxu1 }
 0x106   : > { %v1259_v5 = vpop.f32.mrb[5].mxu1 }
 0x107   : > { %v2516_v9 = vpop.f32.mrb[6].mxu1 }
 0x108   : > { %v1262_v56 = vpop.f32.mrb[7].mxu1 }
 0x10d   : > { %v2518_v6 = vpop.f32.mrb[8].mxu1 }
 0x10e   : > { %v2520_v8 = vpop.f32.mrb[9].mxu1 }
 0x10f   : > { %v2522_v11 = vpop.f32.mrb[10].mxu1 }
 0x110   : > { %v2524_v13 = vpop.f32.mrb[11].mxu1 }
 0x115   : > { %v2526_v14 = vpop.f32.mrb[12].mxu1 }
 0x116   : > { %v2528_v17 = vpop.f32.mrb[13].mxu1 }
 0x117   : > { %v2530_v18 = vpop.f32.mrb[14].mxu1 }
 0x118   : > { %v2532_v19 = vpop.f32.mrb[15].mxu1 }
 0x171   : > { %v1846_v20 = vpop.f32.mrb[0].mxu0 }
 0x172   : > { %v1847_v21 = vpop.f32.mrb[1].mxu0 }
 0x173   : > { %v1848_v7 = vadd.f32 %v1847_v21, %v1846_v20  ;;  %v1849_v12 = vpop.f32.mrb[2].mxu0 }
 0x174   : > { %v1850_v22 = vpop.f32.mrb[3].mxu0 }
 0x175   : > { %v1851_v24 = vadd.f32 %v1850_v22, %v1849_v12  ;;  %v1244_v25 = vadd.f32 %v1848_v7, %v1243_v0 }
 0x177   : > { %v1313_v29 = vmul.f32 %v2537_v23, %v1244_v25  ;;  %v1247_v30 = vadd.f32 %v1851_v24, %v1246_v3 }
 0x179   : > { %v1336_v31 = vadd.f32 %v2542_v28, %v1313_v29  ;;  %v1314_v32 = vmul.f32 %v2537_v23, %v1247_v30  ;;  %v1852_v33 = vpop.f32.mrb[4].mxu0 }
 0x17a   : > { %v1853_v52 = vpop.f32.mrb[5].mxu0 }
 0x17b   : > { %v1337_v27 = vadd.f32 %v2542_v28, %v1314_v32  ;;  %v1854_v34 = vadd.f32 %v1853_v52, %v1852_v33  ;;  %v1855_v35 = vpop.f32.mrb[6].mxu0  ;;  %v1352_v37 = vmax.f32 %v1336_v31, 0.0 }
 0x17c   : > { %v1856_v36 = vpop.f32.mrb[7].mxu0 }
 0x17d   : > { %v1353_v38 = vmax.f32 %v1337_v27, 0.0  ;;  %v1252_v39 = vadd.f32 %v1920_v15, %v1854_v34  ;;  %v1857_v40 = vadd.f32 %v1856_v36, %v1855_v35 }
 0x17f   : > { %v1368_v42 = vpack.c.bf16 %v1353_v38, %v1352_v37  ;;  %v1315_v43 = vmul.f32 %v2537_v23, %v1252_v39  ;;  %v1255_v53 = vadd.f32 %v1921_v1, %v1857_v40 }
 0x181   : > { %v1338_v2 = vadd.f32 %v2542_v28, %v1315_v43  ;;  %v1316_v50 = vmul.f32 %v2537_v23, %v1255_v53  ;;  %v1858_v16 = vpop.f32.mrb[8].mxu0  ;;  %1938 = vmatprep.mubr.msk.bf16.mxu1 %vm821_vm2, %v1368_v42 }
 0x182   : > { %v1859_v44 = vpop.f32.mrb[9].mxu0 }
 0x183   : > { %v1339_v45 = vadd.f32 %v2542_v28, %v1316_v50  ;;  %v1860_v46 = vadd.f32 %v1859_v44, %v1858_v16  ;;  %v1861_v47 = vpop.f32.mrb[10].mxu0  ;;  %v1354_v49 = vmax.f32 %v1338_v2, 0.0 }
 0x184   : > { %v1862_v48 = vpop.f32.mrb[11].mxu0 }
 0x185   : > { %v1355_v51 = vmax.f32 %v1339_v45, 0.0  ;;  %v1863_v54 = vadd.f32 %v1862_v48, %v1861_v47  ;;  %v1260_v55 = vadd.f32 %v1860_v46, %v1259_v5 }
 0x187   : > { %v1369_v26 = vpack.c.bf16 %v1355_v51, %v1354_v49  ;;  %v1317_v62 = vmul.f32 %v2537_v23, %v1260_v55  ;;  %v1263_v57 = vadd.f32 %v1863_v54, %v1262_v56 }
 0x189   : > { %v1340_v10 = vadd.f32 %v2542_v28, %v1317_v62  ;;  %v1318_v58 = vmul.f32 %v2537_v23, %v1263_v57  ;;  %1939 = vmatmul.mubr.msk.bf16.vlgmr.msra.gmra.mrb[16].mxu1 %vm821_vm2, %v1369_v26 }
 0x18b   : > { %v1341_v59 = vadd.f32 %v2542_v28, %v1318_v58  ;;  %v1356_v60 = vmax.f32 %v1340_v10, 0.0 }
 0x18d   : > { %v1357_v61 = vmax.f32 %v1341_v59, 0.0  ;;  %v1864_v63 = vpop.f32.mrb[12].mxu0 }
 0x18e   : > { %v1865_v41 = vpop.f32.mrb[13].mxu0 }
 0x18f   : > { %v1370_v15 = vpack.c.bf16 %v1357_v61, %v1356_v60  ;;  %v1866_v0 = vadd.f32 %v1865_v41, %v1864_v63  ;;  %v1867_v1 = vpop.f32.mrb[14].mxu0 }
 0x190   : > { %v1868_v3 = vpop.f32.mrb[15].mxu0 }
 0x191   : > { %v1268_v5 = vadd.f32 %v2514_v4, %v1866_v0  ;;  %v1869_v20 = vadd.f32 %v1868_v3, %v1867_v1  ;;  %1942 = vmatprep.mubr.msk.bf16.mxu1 %vm821_vm2, %v1370_v15 }
 0x193   : > { %v1319_v56 = vmul.f32 %v2537_v23, %v1268_v5  ;;  %v1271_v21 = vadd.f32 %v2516_v9, %v1869_v20 }
 0x195   : > { %v1342_v7 = vadd.f32 %v2542_v28, %v1319_v56  ;;  %v1320_v12 = vmul.f32 %v2537_v23, %v1271_v21 }
 0x197   : > { %v1343_v22 = vadd.f32 %v2542_v28, %v1320_v12  ;;  %v1358_v24 = vmax.f32 %v1342_v7, 0.0 }
 0x199   : > { %v1359_v25 = vmax.f32 %v1343_v22, 0.0  ;;  %v1870_v29 = vpop.f32.mrb[16].mxu0 }
 0x19a   : > { %v1871_v30 = vpop.f32.mrb[17].mxu0 }
 0x19b   : > { %v1872_v31 = vadd.f32 %v1871_v30, %v1870_v29  ;;  %v1873_v32 = vpop.f32.mrb[18].mxu0  ;;  %v1371_v4 = vpack.c.bf16 %v1359_v25, %v1358_v24 }
 0x19c   : > { %v1874_v33 = vpop.f32.mrb[19].mxu0 }
 0x19d   : > { %v1875_v52 = vadd.f32 %v1874_v33, %v1873_v32  ;;  %v1276_v27 = vadd.f32 %v1872_v31, %v2520_v8  ;;  %1943 = vmatmul.mubr.msk.bf16.gmra.mrb[20].mxu1 %vm821_vm2, %v1371_v4 }
 0x19f   : > { %v1321_v9 = vmul.f32 %v2537_v23, %v1276_v27  ;;  %v1279_v34 = vadd.f32 %v1875_v52, %v2524_v13 }
 0x1a1   : > { %v1344_v35 = vadd.f32 %v2542_v28, %v1321_v9  ;;  %v1322_v36 = vmul.f32 %v2537_v23, %v1279_v34 }
 0x1a3   : > { %v1345_v37 = vadd.f32 %v2542_v28, %v1322_v36  ;;  %v1360_v38 = vmax.f32 %v1344_v35, 0.0 }
 0x1a5   : > { %v1361_v39 = vmax.f32 %v1345_v37, 0.0  ;;  %v1876_v40 = vpop.f32.mrb[20].mxu0 }
 0x1a6   : > { %v1877_v42 = vpop.f32.mrb[21].mxu0 }
 0x1a7   : > { %v1372_v43 = vpack.c.bf16 %v1361_v39, %v1360_v38  ;;  %v1878_v53 = vadd.f32 %v1877_v42, %v1876_v40  ;;  %v1879_v2 = vpop.f32.mrb[22].mxu0 }
 0x1a8   : > { %v1880_v8 = vpop.f32.mrb[23].mxu0 }
 0x1a9   : > { %v1284_v50 = vadd.f32 %v2518_v6, %v1878_v53  ;;  %v1881_v16 = vadd.f32 %v1880_v8, %v1879_v2  ;;  %1946 = vmatprep.mubr.msk.bf16.mxu1 %vm821_vm2, %v1372_v43 }
 0x1ab   : > { %v1323_v13 = vmul.f32 %v2537_v23, %v1284_v50  ;;  %v1287_v44 = vadd.f32 %v2522_v11, %v1881_v16 }
 0x1ad   : > { %v1346_v45 = vadd.f32 %v2542_v28, %v1323_v13  ;;  %v1324_v46 = vmul.f32 %v2537_v23, %v1287_v44 }
 0x1af   : > { %v1347_v47 = vadd.f32 %v2542_v28, %v1324_v46  ;;  %v1362_v48 = vmax.f32 %v1346_v45, 0.0 }
 0x1b1   : > { %v1363_v49 = vmax.f32 %v1347_v47, 0.0  ;;  %v1882_v51 = vpop.f32.mrb[24].mxu0 }
 0x1b2   : > { %v1883_v54 = vpop.f32.mrb[25].mxu0 }
 0x1b3   : > { %v1884_v55 = vadd.f32 %v1883_v54, %v1882_v51  ;;  %v1885_v26 = vpop.f32.mrb[26].mxu0  ;;  %v1373_v6 = vpack.c.bf16 %v1363_v49, %v1362_v48 }
 0x1b4   : > { %v1886_v62 = vpop.f32.mrb[27].mxu0 }
 0x1b5   : > { %v1887_v57 = vadd.f32 %v1886_v62, %v1885_v26  ;;  %v1292_v10 = vadd.f32 %v1884_v55, %v2528_v17  ;;  %1947 = vmatmul.mubr.msk.bf16.gmra.mrb[24].mxu1 %vm821_vm2, %v1373_v6 }
 0x1b7   : > { %v1325_v11 = vmul.f32 %v2537_v23, %v1292_v10  ;;  %v1295_v58 = vadd.f32 %v1887_v57, %v2532_v19 }
 0x1b9   : > { %v1348_v59 = vadd.f32 %v2542_v28, %v1325_v11  ;;  %v1326_v60 = vmul.f32 %v2537_v23, %v1295_v58 }
 0x1bb   : > { %v1349_v61 = vadd.f32 %v2542_v28, %v1326_v60  ;;  %v1364_v63 = vmax.f32 %v1348_v59, 0.0 }
 0x1bd   : > { %v1365_v41 = vmax.f32 %v1349_v61, 0.0  ;;  %v1888_v15 = vpop.f32.mrb[28].mxu0 }
 0x1be   : > { %v1889_v0 = vpop.f32.mrb[29].mxu0 }
 0x1bf   : > { %v1374_v1 = vpack.c.bf16 %v1365_v41, %v1364_v63  ;;  %v1890_v3 = vadd.f32 %v1889_v0, %v1888_v15  ;;  %v1891_v17 = vpop.f32.mrb[30].mxu0 }
 0x1c0   : > { %v1892_v5 = vpop.f32.mrb[31].mxu0 }
 0x1c1   : > { %v1300_v20 = vadd.f32 %v2526_v14, %v1890_v3  ;;  %v1893_v56 = vadd.f32 %v1892_v5, %v1891_v17  ;;  %1950 = vmatprep.mubr.msk.bf16.mxu1 %vm821_vm2, %v1374_v1  ;;  %v1816_v14 = vld [vmem:[%s2652_s6] ss:$0 sm:$0xff]  ;;  %v2084_v1 = vmov (!%p1818_p9), 0.0  }
 0x1c2   : > { %1579 = vst [vmem:[%s2188_s27] sm:$0x1] (!%p1818_p9), %v2084_v1 }
 0x1c3   : > { %v1327_v19 = vmul.f32 %v2537_v23, %v1300_v20  ;;  %v1303_v21 = vadd.f32 %v2530_v18, %v1893_v56 }
 0x1c5   : > { %v1350_v7 = vadd.f32 %v2542_v28, %v1327_v19  ;;  %v1328_v12 = vmul.f32 %v2537_v23, %v1303_v21  ;;  %v1817_v23 = vld [vmem:[%s2653_s7] ss:$0 sm:$0xff] }
 0x1c7   : > { %v1351_v22 = vadd.f32 %v2542_v28, %v1328_v12  ;;  %v1366_v24 = vmax.f32 %v1350_v7, 0.0 }
 0x1c9   : > { %v1367_v25 = vmax.f32 %v1351_v22, 0.0 }
 0x1cb   : > { %v1375_v29 = vpack.c.bf16 %v1367_v25, %v1366_v24 }
 0x1cd   : > { %1951 = vmatmul.mubr.msk.bf16.gmra.mrb[28].mxu1 %vm821_vm2, %v1375_v29 }
 0x25c   : > { %v1940_v18 = vpop.f32.mrb[16].mxu1 }
 0x25d   : > { %v1522_v28 = vmul.f32 %v1940_v18, %v1816_v14  ;;  %v1450_v30 = vpop.f32.mrb[17].mxu1 }
 0x25e   : > { %v1520_v31 = vmul.f32 %v1816_v14, %v1450_v30  ;;  %v1941_v32 = vpop.f32.mrb[18].mxu1 }
 0x25f   : > { %v2607_v4 = vadd.f32 %v1817_v23, %v1522_v28  ;;  %v1523_v33 = vmul.f32 %v1941_v32, %v1816_v14  ;;  %v1453_v52 = vpop.f32.mrb[19].mxu1 }
 0x260   : > { %v1543_v27 = vadd.f32 %v1817_v23, %v1520_v31  ;;  %v1521_v9 = vmul.f32 %v1816_v14, %v1453_v52 }
 0x261   : > { %1561 = vst [vmem:[%s2605_s23 + $0x10] sm:$0xff] %v2607_v4  ;;  %v1546_v34 = vadd.f32 %v1817_v23, %v1523_v33 }
 0x262   : > { %1559 = vst [vmem:[%s2605_s23] sm:$0xff] %v1543_v27  ;;  %v1544_v35 = vadd.f32 %v1817_v23, %v1521_v9 }
 0x263   : > { %1562 = vst [vmem:[%s2605_s23 + $0x18] sm:$0xff] %v1546_v34 }
 0x264   : > { %1560 = vst [vmem:[%s2605_s23 + $0x8] sm:$0xff] %v1544_v35 }
 0x270   : > { %v1944_v36 = vpop.f32.mrb[20].mxu1 }
 0x271   : > { %v1526_v37 = vmul.f32 %v1944_v36, %v1816_v14  ;;  %v1466_v38 = vpop.f32.mrb[21].mxu1 }
 0x272   : > { %v1524_v39 = vmul.f32 %v1816_v14, %v1466_v38  ;;  %v1945_v40 = vpop.f32.mrb[22].mxu1 }
 0x273   : > { %v1549_v42 = vadd.f32 %v1817_v23, %v1526_v37  ;;  %v1527_v43 = vmul.f32 %v1945_v40, %v1816_v14  ;;  %v1469_v53 = vpop.f32.mrb[23].mxu1 }
 0x274   : > { %v1547_v2 = vadd.f32 %v1817_v23, %v1524_v39  ;;  %v1525_v8 = vmul.f32 %v1816_v14, %v1469_v53 }
 0x275   : > { %1565 = vst [vmem:[%s2605_s23 + $0x30] sm:$0xff] %v1549_v42  ;;  %v1550_v50 = vadd.f32 %v1817_v23, %v1527_v43 }
 0x276   : > { %1563 = vst [vmem:[%s2605_s23 + $0x20] sm:$0xff] %v1547_v2  ;;  %v1548_v16 = vadd.f32 %v1817_v23, %v1525_v8 }
 0x277   : > { %1566 = vst [vmem:[%s2605_s23 + $0x38] sm:$0xff] %v1550_v50 }
 0x278   : > { %1564 = vst [vmem:[%s2605_s23 + $0x28] sm:$0xff] %v1548_v16 }
 0x288   : > { %v1948_v13 = vpop.f32.mrb[24].mxu1 }
 0x289   : > { %v1530_v44 = vmul.f32 %v1948_v13, %v1816_v14  ;;  %v1482_v45 = vpop.f32.mrb[25].mxu1 }
 0x28a   : > { %v1528_v46 = vmul.f32 %v1816_v14, %v1482_v45  ;;  %v1949_v47 = vpop.f32.mrb[26].mxu1 }
 0x28b   : > { %v1553_v48 = vadd.f32 %v1817_v23, %v1530_v44  ;;  %v1531_v49 = vmul.f32 %v1949_v47, %v1816_v14  ;;  %v1485_v51 = vpop.f32.mrb[27].mxu1 }
 0x28c   : > { %v1551_v54 = vadd.f32 %v1817_v23, %v1528_v46  ;;  %v1529_v55 = vmul.f32 %v1816_v14, %v1485_v51 }
 0x28d   : > { %1569 = vst [vmem:[%s2605_s23 + $0x50] sm:$0xff] %v1553_v48  ;;  %v1554_v26 = vadd.f32 %v1817_v23, %v1531_v49 }
 0x28e   : > { %1567 = vst [vmem:[%s2605_s23 + $0x40] sm:$0xff] %v1551_v54  ;;  %v1552_v6 = vadd.f32 %v1817_v23, %v1529_v55 }
 0x28f   : > { %1570 = vst [vmem:[%s2605_s23 + $0x58] sm:$0xff] %v1554_v26 }
 0x290   : > { %1568 = vst [vmem:[%s2605_s23 + $0x48] sm:$0xff] %v1552_v6 }
 0x2a0   : > { %v1952_v62 = vpop.f32.mrb[28].mxu1 }
 0x2a1   : > { %v1534_v57 = vmul.f32 %v1952_v62, %v1816_v14  ;;  %v1498_v10 = vpop.f32.mrb[29].mxu1 }
 0x2a2   : > { %v1532_v11 = vmul.f32 %v1816_v14, %v1498_v10  ;;  %v1953_v58 = vpop.f32.mrb[30].mxu1  ;;  %1578 = sbr.rel (%p1818_p9) target bundleno = 681 (0x2a9), region = 56 }
 0x2a3   : > { %v1557_v59 = vadd.f32 %v1817_v23, %v1534_v57  ;;  %v1535_v60 = vmul.f32 %v1953_v58, %v1816_v14  ;;  %v1501_v61 = vpop.f32.mrb[31].mxu1 }
 0x2a4   : > { %v1555_v63 = vadd.f32 %v1817_v23, %v1532_v11  ;;  %v1533_v41 = vmul.f32 %v1816_v14, %v1501_v61 }
 0x2a5   : > { %1573 = vst [vmem:[%s2605_s23 + $0x70] sm:$0xff] %v1557_v59  ;;  %v1558_v15 = vadd.f32 %v1817_v23, %v1535_v60 }
 0x2a6   : > { %1571 = vst [vmem:[%s2605_s23 + $0x60] sm:$0xff] %v1555_v63  ;;  %v1556_v0 = vadd.f32 %v1817_v23, %v1533_v41 }
 0x2a7   : > { %1574 = vst [vmem:[%s2605_s23 + $0x78] sm:$0xff] %v1558_v15 }
 0x2a8   : > { %1572 = vst [vmem:[%s2605_s23 + $0x68] sm:$0xff] %v1556_v0 }
 0x2a9 PF: > { %v1581_v3 = vadd.f32 %v1544_v35, %v1543_v27 }
 0x2ab   : > { %v1582_v17 = vadd.f32 %v1581_v3, %v2607_v4  ;;  %v1580_v4 = vld [vmem:[%s2188_s27] sm:$0x1] }
 0x2ad   : > { %v1583_v5 = vadd.f32 %v1582_v17, %v1546_v34 }
 0x2af   : > { %v1584_v20 = vadd.f32 %v1583_v5, %v1547_v2 }
 0x2b1   : > { %v1585_v56 = vadd.f32 %v1584_v20, %v1548_v16 }
 0x2b3   : > { %v1586_v19 = vadd.f32 %v1585_v56, %v1549_v42 }
 0x2b5   : > { %v1587_v21 = vadd.f32 %v1586_v19, %v1550_v50 }
 0x2b7   : > { %v1588_v7 = vadd.f32 %v1587_v21, %v1551_v54 }
 0x2b9   : > { %v1589_v12 = vadd.f32 %v1588_v7, %v1552_v6 }
 0x2bb   : > { %v1590_v22 = vadd.f32 %v1589_v12, %v1553_v48 }
 0x2bd   : > { %v1591_v24 = vadd.f32 %v1590_v22, %v1554_v26 }
 0x2bf   : > { %v1592_v25 = vadd.f32 %v1591_v24, %v1555_v63 }
 0x2c1   : > { %v1593_v29 = vadd.f32 %v1592_v25, %v1556_v0 }
 0x2c3   : > { %v1594_v14 = vadd.f32 %v1593_v29, %v1557_v59 }
 0x2c5   : > { %v1595_v18 = vadd.f32 %v1594_v14, %v1558_v15 }
 0x2c7   : > { %v1596_v23 = vrot.slane %v1595_v18, 4 }
 0x2c9   : > { %v1597_v28 = vadd.f32 %v1596_v23, %v1595_v18 }
 0x2cb   : > { %v1598_v30 = vrot.slane %v1597_v28, 2 }
 0x2cd   : > { %v1599_v31 = vadd.f32 %v1598_v30, %v1597_v28 }
 0x2cf   : > { %v1600_v32 = vrot.slane %v1599_v31, 1 }
 0x2d1   : > { %v1601_v33 = vadd.f32 %v1600_v32, %v1599_v31 }
 0x2d3   : > { %v1602_v52 = vadd.f32 %v1601_v33, %v1580_v4 }
 0x2d5   : > { %1603 = vst [vmem:[%s2188_s27] sm:$0x1] %v1602_v52 }
 0x2d6 PF: > { %s20_s13 = sadd.s32 1, %s2079_s13   ;;  %s2660_s29 = sld [smem:[#allocation2_spill]] }
 0x2d7   : > { %p17_p10 = scmp.ge.s32.totalorder %s20_s13, 6   ;;  %s2661_s30 = smov %s2071_s11 }
 0x2d8   : > { %s2662_s10 = smov %s2075_s12  ;;  %s2663_s11 = smov %s2666_s14 }
 0x2d9   :  { %19 = sbr.rel (!%p17_p10) target bundleno = 3 (0x3), region = 101 }
 0x2dc   : > { %s2664_s12 = smov %s2660_s29 }

</bundles_post_ra>
